<compile_context>
chip_gen: v7x
topology: tpu7x:2x2x1
jax: 0.10.0
libtpu: 0.0.40
codegen_flags: <defaults>
</compile_context>

<pallas_src>
import functools

import jax
import jax.numpy as jnp
from jax import lax
from jax.experimental import pallas as pl
from jax.experimental.pallas import tpu as pltpu


def _cdiv(a: int, b: int) -> int:
    return -(-a // b)


def _round_up(x: int, m: int) -> int:
    return ((x + m - 1) // m) * m


def _chip_params():
    """(target input-block bytes, # TensorCores) for the local TPU generation."""
    kind = ""
    try:
        kind = jax.devices()[0].device_kind.lower()
    except Exception:  # pragma: no cover - defensive
        pass
    if "v7" in kind:
        return 8 << 20, 2   # 3.2 TB/s per TC, 2 TCs, 32 MiB default scoped VMEM
    if "v6" in kind:
        return 4 << 20, 1   # 1.4 TB/s, 32 MiB default scoped VMEM
    if "v5" in kind:
        return 2 << 20, 1   # 0.8 TB/s, 16 MiB default scoped VMEM (v5e)
    return 2 << 20, 1       # unknown chip: be conservative


def _mean_pool_single_kernel(x_ref, o_ref, *, inv_n: float):
    # x_ref: (TB, M, HH) -- the whole node extent in one block.
    s = jnp.sum(x_ref[...].astype(jnp.float32), axis=1)
    o_ref[...] = (s * inv_n).astype(o_ref.dtype)


def _mean_pool_chunked_kernel(x_ref, o_ref, acc_ref, *, inv_n: float,
                              n_nodes: int, tn: int, needs_mask: bool):
    # x_ref: (TB, TN, HH) node-feature block; o_ref: (TB, HH); acc_ref: f32 (TB, HH).
    k = pl.program_id(1)
    last = pl.num_programs(1) - 1

    @pl.when(k == 0)
    def _init():
        acc_ref[...] = jnp.zeros_like(acc_ref)

    if needs_mask:
        # Only the final node block has a ragged tail: mask rows whose global
        # node index is >= n_nodes (OOB VMEM contents are unspecified).
        @pl.when(k == last)
        def _masked_add():
            x = x_ref[...].astype(jnp.float32)
            node = k * tn + lax.broadcasted_iota(jnp.int32, x.shape, 1)
            acc_ref[...] += jnp.sum(jnp.where(node < n_nodes, x, 0.0), axis=1)

        @pl.when(k != last)
        def _full_add():
            acc_ref[...] += jnp.sum(x_ref[...].astype(jnp.float32), axis=1)
    else:
        acc_ref[...] += jnp.sum(x_ref[...].astype(jnp.float32), axis=1)

    @pl.when(k == last)
    def _finalize():
        o_ref[...] = (acc_ref[...] * inv_n).astype(o_ref.dtype)


def pooling_layer(node_fea: jax.Array, *, target_block_bytes: int | None = None) -> jax.Array:
    """Mean-pool over the node axis (dim=1), matching PoolingLayer.forward."""
    B, N, H = node_fea.shape
    dtype = node_fea.dtype
    itemsize = jnp.dtype(dtype).itemsize

    # Tiny inputs: a separate pallas_call launch + HBM round trip loses to
    # XLA's fused reduce.  (Also covers N == 0 -> NaN, like torch.)
    # TODO(synk): for production chem-GCN sizes, fuse this pool into the
    # upstream graph-conv epilogue instead of paying a separate launch.
    if N == 0 or B * N * H * itemsize < (256 << 10):
        return jnp.mean(node_fea, axis=1)

    chip_block_bytes, num_cores = _chip_params()
    if target_block_bytes is None:
        target_block_bytes = chip_block_bytes

    inv_n = 1.0 / N

    # Lane-densify small hidden dims: fold `fold` nodes into the lane axis so
    # the last dim is ~128 wide.  Row-major reshape is free (no HBM copy); we
    # only do it when N % fold == 0 so no padding is needed.  The kernel then
    # produces per-fold partial sums; the tiny (B, fold, H) combine is outside.
    fold = 1
    x = node_fea
    if H < 128:
        f = max(1, 128 // H)
        if f > 1 and N % f == 0:
            fold = f
            x = x.reshape(B, N // fold, fold * H)
    _, M, HH = x.shape  # M = N // fold, HH = fold * H

    # Block-size budget uses the lane/sublane-padded VMEM footprint so layouts
    # with HH < 128 cannot exceed the default scoped-VMEM limit.
    vmem_row_bytes = _round_up(HH, 128) * itemsize
    graph_vmem_bytes = max(1, _round_up(M, 8) * vmem_row_bytes)

    if 8 * graph_vmem_bytes > target_block_bytes:
        # Even 8 graphs per block exceed the budget: chunk the node axis into
        # balanced, 8-aligned pieces (masked tail wastes <= 7 rows).
        tb = 8
        tn_max = max(8, (target_block_bytes // (tb * vmem_row_bytes)) // 8 * 8)
        n_chunks = _cdiv(M, tn_max)
        tn = min(_round_up(_cdiv(M, n_chunks), 8), _round_up(M, 8))
    else:
        tn = M
        tb = max(8, (target_block_bytes // graph_vmem_bytes) // 8 * 8)

    tb = min(tb, _round_up(B, 8))

    # Multi-TensorCore chips (v7x megacore): keep the parallel batch axis at an
    # equal number of grid steps per core.  Single-TC chips skip this (halving
    # the block there only doubles per-step overhead).
    if num_cores > 1 and B > 8 * num_cores:
        steps = _cdiv(B, tb)
        if steps % num_cores != 0:
            want = _round_up(steps, num_cores)
            tb = max(8, _round_up(_cdiv(B, want), 8))

    out_dtype = jnp.float32 if fold > 1 else dtype

    if tn >= M:
        # Whole node extent in one block: direct store, no scratch accumulator.
        tn = M
        kernel = functools.partial(_mean_pool_single_kernel, inv_n=inv_n)
        out = pl.pallas_call(
            kernel,
            out_shape=jax.ShapeDtypeStruct((B, HH), out_dtype),
            grid_spec=pltpu.PrefetchScalarGridSpec(
                num_scalar_prefetch=0,
                grid=(_cdiv(B, tb),),
                in_specs=[pl.BlockSpec((tb, M, HH), lambda b: (b, 0, 0))],
                out_specs=pl.BlockSpec((tb, HH), lambda b: (b, 0)),
            ),
            compiler_params=pltpu.CompilerParams(
                dimension_semantics=("parallel",)),
        )(x)
    else:
        needs_mask = (M % tn) != 0
        kernel = functools.partial(
            _mean_pool_chunked_kernel, inv_n=inv_n, n_nodes=M, tn=tn,
            needs_mask=needs_mask)
        out = pl.pallas_call(
            kernel,
            out_shape=jax.ShapeDtypeStruct((B, HH), out_dtype),
            grid_spec=pltpu.PrefetchScalarGridSpec(
                num_scalar_prefetch=0,
                grid=(_cdiv(B, tb), _cdiv(M, tn)),
                in_specs=[pl.BlockSpec((tb, tn, HH), lambda b, k: (b, k, 0))],
                out_specs=pl.BlockSpec((tb, HH), lambda b, k: (b, 0)),
                scratch_shapes=[pltpu.VMEM((tb, HH), jnp.float32)],
            ),
            compiler_params=pltpu.CompilerParams(
                # batch axis independent (megacore-shardable); node-chunk axis
                # is the reduction -> "arbitrary", placed last in the grid.
                dimension_semantics=("parallel", "arbitrary")),
        )(x)

    if fold > 1:
        out = out.reshape(B, fold, H).sum(axis=1)
    return out.astype(dtype)


if __name__ == "__main__":
    root = jax.random.PRNGKey(0)

    cases = [
        # Small shape implied by the module: goes through the XLA fast path.
        ((2, 8, 32), {}),
        # H=32 -> lane-folded (fold=4) single-block kernel path.
        ((64, 256, 32), {}),
        # Full-extent node block, N not a multiple of 8, H < 128, fold skipped.
        ((40, 129, 64), {}),
        # Node-chunked + masked node tail + partial batch tail (forced via a
        # small block budget so this path is exercised on every chip).
        ((13, 1000, 256), {"target_block_bytes": 1 << 20}),
    ]

    keys = jax.random.split(root, len(cases))
    for (shape, kw), k in zip(cases, keys):
        x = jax.random.normal(k, shape, dtype=jnp.float32)
        got = jax.block_until_ready(pooling_layer(x, **kw))
        ref = jnp.mean(x, axis=1)
        assert got.shape == ref.shape, (shape, got.shape, ref.shape)
        assert jnp.allclose(got, ref, atol=1e-5, rtol=1e-5), shape

    print("KERNEL_OK")
</pallas_src>

<mosaic_0001>
module attributes {stable_mosaic.version = 11 : i64} {
  func.func @_mean_pool_single_kernel(%arg0: i32, %arg1: memref<64x64x128xf32, #tpu.memory_space<vmem>>, %arg2: memref<64x128xf32, #tpu.memory_space<vmem>>) attributes {dimension_semantics = [#tpu.dimension_semantics<parallel>], iteration_bounds = array<i64: 1>, scalar_prefetch = 0 : i64, scratch_operands = 0 : i64, tpu.core_type = #tpu.core_type<tc>, window_params = [{transform_indices = @transform_0, window_bounds = array<i64: 64, 64, 128>}, {transform_indices = @transform_1, window_bounds = array<i64: 64, 128>}]} {
    %c0 = arith.constant 0 : index
    %c0_0 = arith.constant 0 : index
    %c0_1 = arith.constant 0 : index
    %0 = vector.load %arg1[%c0, %c0_0, %c0_1] : memref<64x64x128xf32, #tpu.memory_space<vmem>>, vector<64x64x128xf32>
    %cst = arith.constant dense<0.000000e+00> : vector<64x128xf32>
    %1 = vector.multi_reduction <add>, %0, %cst [1] : vector<64x64x128xf32> to vector<64x128xf32>
    %cst_2 = arith.constant 3.906250e-03 : f32
    %2 = vector.broadcast %cst_2 : f32 to vector<64x128xf32>
    %3 = arith.mulf %1, %2 : vector<64x128xf32>
    %c0_3 = arith.constant 0 : index
    %c0_4 = arith.constant 0 : index
    %4 = vector.load %arg2[%c0_3, %c0_4] : memref<64x128xf32, #tpu.memory_space<vmem>>, vector<64x128xf32>
    tpu.vector_store %arg2[%c0_3, %c0_4], %3 {strides = array<i32>} : memref<64x128xf32, #tpu.memory_space<vmem>>, vector<64x128xf32>,
    return
  }
  func.func @transform_0(%arg0: i32) -> (i32, i32, i32) {
    %c0_i32 = arith.constant 0 : i32
    %c0_i32_0 = arith.constant 0 : i32
    %c0_i32_1 = arith.constant 0 : i32
    return %arg0, %c0_i32, %c0_i32_0 : i32, i32, i32
  }
  func.func @transform_1(%arg0: i32) -> (i32, i32) {
    %c0_i32 = arith.constant 0 : i32
    %c0_i32_0 = arith.constant 0 : i32
    return %arg0, %c0_i32 : i32, i32
  }
}

</mosaic_0001>

<bundles_post_ra>
// kernel: tpu_custom_call.1
= control target key start
LH: loop header
LB: loop body
LE: loop exit
PB: predicated region body
PF: predicated region fallthrough
CT: control target
= control target key end

     0   :  { %6 = vsyncpa [#allocation3], 0  ;;  %s2079_s0 = inlined_call_operand.hbm [shape: f32[64,64,128], index: 0, kind: input, shape index: {}]   ;;  %s2080_s1 = inlined_call_operand.hbm [shape: f32[64,128], index: 1, kind: output, shape index: {}]  }
   0x1   :  { %7 = vsyncpa [#allocation4], 0  ;;  %s1643_s6 = smov [#allocation2]   ;;  %s1595_s10 = scalar_lea.hbm %s2079_s0, 65536 }
   0x2   :  { %s13_s7 = sshll.u32 %s1643_s6, 4  ;;  %p1596_p0 = scmp.ne.s32.totalorder %s2079_s0, %s1595_s10  ;;  %s14_s7 = int_to_ptr.vmem [resolvable:$true] %s13_s7 }
   0x3   :  { %p1599_p1 = scmp.lt.u32.totalorder %s1595_s10, %s2079_s0 }
   0x5   :  { %p1601_p2 = pnand %p1599_p1, %p1596_p0 }
   0x7   :  { %1604 = shalt.err (!%p1601_p2)
}
   0x8   :  { %s1605_s15 = scalar_lea.vmem %s14_s7, 65536  ;;  %p1610_p4 = scmp.lt.s32.totalorder %s14_s7, %s14_s7 }
   0x9   :  { %p1606_p3 = scmp.ne.s32.totalorder %s14_s7, %s1605_s15  ;;  %p1611_p5 = scmp.lt.s32.totalorder %s1605_s15, %s1605_s15 }
   0xb   :  { %p1612_p6 = por %p1611_p5, %p1610_p4 }
   0xd   :  { %p1613_p7 = pnand %p1612_p6, %p1606_p3 }
   0xf   :  { %1616 = shalt.err (!%p1613_p7)
}
  0x10   :  { %s1644_s16 = smov 128   ;;  %s1645_s17 = smov 8  }
  0x11   :  { %19 = dma.hbm_to_vmem [thread:$0]  %s2079_s0, 65536, %s14_s7, [#allocation3], %s1644_s16, %s1644_s16, %s1645_s17  }
  0x12   :  { %1639 = dma.done.wait [#allocation3], 65536  }
  0x13   :  { %1640 = vsyncadd [#allocation3], 4294901760  ;;  %v23_v0 = vld [vmem:[#allocation2] sm:$0xff]  ;;  %v24_v1 = vld [vmem:[#allocation2 + $0x8] sm:$0xff]  ;;  %vm1495_vm0 = vcmask 1041409   ;;  %vm1497_vm1 = vcmask 1042434  }
  0x14   :  { %v31_v2 = vld [vmem:[#allocation2 + $0x40] sm:$0xff]  ;;  %v32_v3 = vld [vmem:[#allocation2 + $0x48] sm:$0xff]  ;;  %v25_v7 = vld [vmem:[#allocation2 + $0x10] sm:$0xff]  ;;  %v535_v26 = vadd.f32 %v24_v1, %v23_v0  ;;  %vm1499_vm2 = vcmask 1043459   ;;  %vm1501_vm3 = vcmask 1044484   ;;  %vm1503_vm4 = vcmask 1045509  }
  0x15   :  { %v39_v4 = vld [vmem:[#allocation2 + $0x80] sm:$0xff]  ;;  %v40_v5 = vld [vmem:[#allocation2 + $0x88] sm:$0xff]  ;;  %v33_v8 = vld [vmem:[#allocation2 + $0x50] sm:$0xff]  ;;  %v548_v27 = vadd.f32 %v32_v3, %v31_v2  ;;  %vm1505_vm5 = vcmask 1046534   ;;  %vm1507_vm6 = vcmask 1047559   ;;  %s1646_s0 = smov [#allocation5]  }
  0x16   :  { %v87_v6 = vld [vmem:[#allocation2 + $0x200] sm:$0xff]  ;;  %v88_v10 = vld [vmem:[#allocation2 + $0x208] sm:$0xff]  ;;  %v41_v13 = vld [vmem:[#allocation2 + $0x90] sm:$0xff]  ;;  %v561_v35 = vadd.f32 %v40_v5, %v39_v4  ;;  %v536_v41 = vadd.f32 %v535_v26, %v25_v7  ;;  %s1579_s20 = sshll.u32 %s1646_s0, 4  ;;  %s1580_s20 = int_to_ptr.vmem [resolvable:$true] %s1579_s20 }
  0x17   :  { %v47_v9 = vld [vmem:[#allocation2 + $0xc0] sm:$0xff]  ;;  %v96_v12 = vld [vmem:[#allocation2 + $0x248] sm:$0xff]  ;;  %v26_v17 = vld [vmem:[#allocation2 + $0x18] sm:$0xff]  ;;  %v639_v28 = vadd.f32 %v88_v10, %v87_v6  ;;  %v549_v42 = vadd.f32 %v548_v27, %v33_v8  ;;  %s1617_s21 = scalar_lea.vmem %s1580_s20, 1024  ;;  %p1622_p9 = scmp.lt.s32.totalorder %s1580_s20, %s1580_s20 }
  0x18   :  { %v95_v11 = vld [vmem:[#allocation2 + $0x240] sm:$0xff]  ;;  %v48_v14 = vld [vmem:[#allocation2 + $0xc8] sm:$0xff]  ;;  %v34_v18 = vld [vmem:[#allocation2 + $0x58] sm:$0xff]  ;;  %v562_v50 = vadd.f32 %v561_v35, %v41_v13  ;;  %v537_v57 = vadd.f32 %v536_v41, %v26_v17  ;;  %p1618_p8 = scmp.ne.s32.totalorder %s1580_s20, %s1617_s21  ;;  %p1623_p10 = scmp.lt.s32.totalorder %s1617_s21, %s1617_s21 }
  0x19   :  { %v103_v15 = vld [vmem:[#allocation2 + $0x280] sm:$0xff]  ;;  %v104_v16 = vld [vmem:[#allocation2 + $0x288] sm:$0xff]  ;;  %v49_v19 = vld [vmem:[#allocation2 + $0xd0] sm:$0xff]  ;;  %v652_v29 = vadd.f32 %v96_v12, %v95_v11  ;;  %v574_v43 = vadd.f32 %v48_v14, %v47_v9  ;;  %v550_v58 = vadd.f32 %v549_v42, %v34_v18 }
  0x1a   :  { %v55_v20 = vld [vmem:[#allocation2 + $0x100] sm:$0xff]  ;;  %v89_v21 = vld [vmem:[#allocation2 + $0x210] sm:$0xff]  ;;  %v42_v22 = vld [vmem:[#allocation2 + $0x98] sm:$0xff]  ;;  %v665_v36 = vadd.f32 %v104_v16, %v103_v15  ;;  %p1624_p11 = por %p1623_p10, %p1622_p9 }
  0x1b   :  { %v56_v23 = vld [vmem:[#allocation2 + $0x108] sm:$0xff]  ;;  %v97_v24 = vld [vmem:[#allocation2 + $0x250] sm:$0xff]  ;;  %v27_v30 = vld [vmem:[#allocation2 + $0x20] sm:$0xff]  ;;  %v640_v44 = vadd.f32 %v639_v28, %v89_v21  ;;  %v575_v59 = vadd.f32 %v574_v43, %v49_v19  ;;  %v563_v2 = vadd.f32 %v562_v50, %v42_v22 }
  0x1c   :  { %v105_v25 = vld [vmem:[#allocation2 + $0x290] sm:$0xff]  ;;  %v35_v31 = vld [vmem:[#allocation2 + $0x60] sm:$0xff]  ;;  %v64_v34 = vld [vmem:[#allocation2 + $0x148] sm:$0xff]  ;;  %v587_v51 = vadd.f32 %v56_v23, %v55_v20  ;;  %v1672_v52 = vadd.f32 %v652_v29, %v97_v24  ;;  %v538_v9 = vadd.f32 %v537_v57, %v27_v30  ;;  %p1625_p12 = pnand %p1624_p11, %p1618_p8 }
  0x1d   :  { %v57_v32 = vld [vmem:[#allocation2 + $0x110] sm:$0xff]  ;;  %v63_v33 = vld [vmem:[#allocation2 + $0x140] sm:$0xff]  ;;  %v72_v39 = vld [vmem:[#allocation2 + $0x188] sm:$0xff]  ;;  %v1674_v53 = vadd.f32 %v665_v36, %v105_v25  ;;  %v551_v10 = vadd.f32 %v550_v58, %v35_v31 }
  0x1e   :  { %v43_v37 = vld [vmem:[#allocation2 + $0xa0] sm:$0xff]  ;;  %v90_v40 = vld [vmem:[#allocation2 + $0x218] sm:$0xff]  ;;  %v28_v45 = vld [vmem:[#allocation2 + $0x28] sm:$0xff]  ;;  %v600_v60 = vadd.f32 %v64_v34, %v63_v33  ;;  %v588_v3 = vadd.f32 %v587_v51, %v57_v32 }
  0x1f   :  { %v71_v38 = vld [vmem:[#allocation2 + $0x180] sm:$0xff]  ;;  %v36_v46 = vld [vmem:[#allocation2 + $0x68] sm:$0xff]  ;;  %v50_v47 = vld [vmem:[#allocation2 + $0xd8] sm:$0xff]  ;;  %v1676_v5 = vadd.f32 %v640_v44, %v90_v40  ;;  %v564_v18 = vadd.f32 %v563_v2, %v43_v37  ;;  %v539_v25 = vadd.f32 %v538_v9, %v28_v45 }
  0x20   :  { %v58_v48 = vld [vmem:[#allocation2 + $0x118] sm:$0xff]  ;;  %v65_v49 = vld [vmem:[#allocation2 + $0x150] sm:$0xff]  ;;  %v79_v55 = vld [vmem:[#allocation2 + $0x1c0] sm:$0xff]  ;;  %v613_v4 = vadd.f32 %v72_v39, %v71_v38  ;;  %v576_v11 = vadd.f32 %v575_v59, %v50_v47  ;;  %v552_v26 = vadd.f32 %v551_v10, %v36_v46 }
  0x21   :  { %v73_v54 = vld [vmem:[#allocation2 + $0x190] sm:$0xff]  ;;  %v80_v56 = vld [vmem:[#allocation2 + $0x1c8] sm:$0xff]  ;;  %v51_v0 = vld [vmem:[#allocation2 + $0xe0] sm:$0xff]  ;;  %v601_v12 = vadd.f32 %v600_v60, %v65_v49  ;;  %v589_v19 = vadd.f32 %v588_v3, %v58_v48 }
  0x22   :  { %v29_v61 = vld [vmem:[#allocation2 + $0x30] sm:$0xff]  ;;  %v44_v63 = vld [vmem:[#allocation2 + $0xa8] sm:$0xff]  ;;  %v66_v1 = vld [vmem:[#allocation2 + $0x158] sm:$0xff]  ;;  %v614_v20 = vadd.f32 %v613_v4, %v73_v54  ;;  %v626_v21 = vadd.f32 %v80_v56, %v79_v55  ;;  %v577_v27 = vadd.f32 %v576_v11, %v51_v0 }
  0x23   :  { %v37_v62 = vld [vmem:[#allocation2 + $0x70] sm:$0xff]  ;;  %v59_v6 = vld [vmem:[#allocation2 + $0x120] sm:$0xff]  ;;  %v74_v7 = vld [vmem:[#allocation2 + $0x198] sm:$0xff]  ;;  %v602_v28 = vadd.f32 %v601_v12, %v66_v1  ;;  %v565_v32 = vadd.f32 %v564_v18, %v44_v63  ;;  %v540_v39 = vadd.f32 %v539_v25, %v29_v61 }
  0x24   :  { %v81_v8 = vld [vmem:[#allocation2 + $0x1d0] sm:$0xff]  ;;  %v30_v13 = vld [vmem:[#allocation2 + $0x38] sm:$0xff]  ;;  %v52_v16 = vld [vmem:[#allocation2 + $0xe8] sm:$0xff]  ;;  %v590_v33 = vadd.f32 %v589_v19, %v59_v6  ;;  %v615_v34 = vadd.f32 %v614_v20, %v74_v7  ;;  %v553_v40 = vadd.f32 %v552_v26, %v37_v62 }
  0x25   :  { %v38_v14 = vld [vmem:[#allocation2 + $0x78] sm:$0xff]  ;;  %v45_v15 = vld [vmem:[#allocation2 + $0xb0] sm:$0xff]  ;;  %v67_v17 = vld [vmem:[#allocation2 + $0x160] sm:$0xff]  ;;  %v627_v35 = vadd.f32 %v626_v21, %v81_v8  ;;  %v578_v41 = vadd.f32 %v577_v27, %v52_v16  ;;  %v541_v54 = vadd.f32 %v540_v39, %v30_v13 }
  0x26   :  { %v60_v22 = vld [vmem:[#allocation2 + $0x128] sm:$0xff]  ;;  %v75_v23 = vld [vmem:[#allocation2 + $0x1a0] sm:$0xff]  ;;  %v82_v24 = vld [vmem:[#allocation2 + $0x1d8] sm:$0xff]  ;;  %v603_v42 = vadd.f32 %v602_v28, %v67_v17  ;;  %v566_v45 = vadd.f32 %v565_v32, %v45_v15  ;;  %v554_v55 = vadd.f32 %v553_v40, %v38_v14 }
  0x27   :  { %v46_v29 = vld [vmem:[#allocation2 + $0xb8] sm:$0xff]  ;;  %v53_v30 = vld [vmem:[#allocation2 + $0xf0] sm:$0xff]  ;;  %v68_v31 = vld [vmem:[#allocation2 + $0x168] sm:$0xff]  ;;  %v591_v46 = vadd.f32 %v590_v33, %v60_v22  ;;  %v616_v47 = vadd.f32 %v615_v34, %v75_v23  ;;  %v628_v48 = vadd.f32 %v627_v35, %v82_v24  ;;  %v542_v1 = vrot.slane %v541_v54, 4 }
  0x28   :  { %v61_v36 = vld [vmem:[#allocation2 + $0x130] sm:$0xff]  ;;  %v76_v38 = vld [vmem:[#allocation2 + $0x1a8] sm:$0xff]  ;;  %v83_v37 = vld [vmem:[#allocation2 + $0x1e0] sm:$0xff]  ;;  %v579_v56 = vadd.f32 %v578_v41, %v53_v30  ;;  %v604_v57 = vadd.f32 %v603_v42, %v68_v31  ;;  %v567_v59 = vadd.f32 %v566_v45, %v46_v29  ;;  %v555_v2 = vrot.slane %v554_v55, 4 }
  0x29   :  { %v54_v43 = vld [vmem:[#allocation2 + $0xf8] sm:$0xff]  ;;  %v69_v44 = vld [vmem:[#allocation2 + $0x170] sm:$0xff]  ;;  %v84_v51 = vld [vmem:[#allocation2 + $0x1e8] sm:$0xff]  ;;  %v592_v60 = vadd.f32 %v591_v46, %v61_v36  ;;  %v617_v61 = vadd.f32 %v616_v47, %v76_v38  ;;  %v629_v62 = vadd.f32 %v628_v48, %v83_v37  ;;  %v543_v11 = vadd.f32 %v542_v1, %v541_v54 }
  0x2a   :  { %v62_v49 = vld [vmem:[#allocation2 + $0x138] sm:$0xff]  ;;  %v77_v50 = vld [vmem:[#allocation2 + $0x1b0] sm:$0xff]  ;;  %v580_v3 = vadd.f32 %v579_v56, %v54_v43  ;;  %v605_v4 = vadd.f32 %v604_v57, %v69_v44  ;;  %v568_v6 = vrot.slane %v567_v59, 4  ;;  %v556_v12 = vadd.f32 %v555_v2, %v554_v55  ;;  %v91_v39 = vld [vmem:[#allocation2 + $0x220] sm:$0xff] }
  0x2b   :  { %v70_v58 = vld [vmem:[#allocation2 + $0x178] sm:$0xff]  ;;  %v85_v0 = vld [vmem:[#allocation2 + $0x1f0] sm:$0xff]  ;;  %v593_v7 = vadd.f32 %v592_v60, %v62_v49  ;;  %v618_v8 = vadd.f32 %v617_v61, %v77_v50  ;;  %v630_v9 = vadd.f32 %v629_v62, %v84_v51  ;;  %v544_v19 = vrot.slane %v543_v11, 2  ;;  %v92_v45 = vld [vmem:[#allocation2 + $0x228] sm:$0xff] }
  0x2c   :  { %v78_v63 = vld [vmem:[#allocation2 + $0x1b8] sm:$0xff]  ;;  %v581_v13 = vrot.slane %v580_v3, 4  ;;  %v606_v14 = vadd.f32 %v605_v4, %v70_v58  ;;  %v569_v15 = vadd.f32 %v568_v6, %v567_v59  ;;  %v557_v20 = vrot.slane %v556_v12, 2  ;;  %v99_v46 = vld [vmem:[#allocation2 + $0x260] sm:$0xff]  ;;  %v93_v54 = vld [vmem:[#allocation2 + $0x230] sm:$0xff] }
  0x2d   :  { %v86_v10 = vld [vmem:[#allocation2 + $0x1f8] sm:$0xff]  ;;  %v594_v16 = vrot.slane %v593_v7, 4  ;;  %v619_v17 = vadd.f32 %v618_v8, %v78_v63  ;;  %v631_v18 = vadd.f32 %v630_v9, %v85_v0  ;;  %v545_v27 = vadd.f32 %v544_v19, %v543_v11  ;;  %v100_v55 = vld [vmem:[#allocation2 + $0x268] sm:$0xff]  ;;  %v107_v56 = vld [vmem:[#allocation2 + $0x2a0] sm:$0xff] }
  0x2e   :  { %v582_v21 = vadd.f32 %v581_v13, %v580_v3  ;;  %v607_v22 = vrot.slane %v606_v14, 4  ;;  %v570_v23 = vrot.slane %v569_v15, 2  ;;  %v558_v28 = vadd.f32 %v557_v20, %v556_v12  ;;  %v98_v40 = vld [vmem:[#allocation2 + $0x258] sm:$0xff]  ;;  %v111_v57 = vld [vmem:[#allocation2 + $0x2c0] sm:$0xff]  ;;  %v112_v58 = vld [vmem:[#allocation2 + $0x2c8] sm:$0xff] }
  0x2f   :  { %v595_v24 = vadd.f32 %v594_v16, %v593_v7  ;;  %v620_v25 = vrot.slane %v619_v17, 4  ;;  %v632_v26 = vadd.f32 %v631_v18, %v86_v10  ;;  %v546_v35 = vrot.slane %v545_v27, 1  ;;  %v106_v47 = vld [vmem:[#allocation2 + $0x298] sm:$0xff]  ;;  %v108_v63 = vld [vmem:[#allocation2 + $0x2a8] sm:$0xff]  ;;  %v119_v0 = vld [vmem:[#allocation2 + $0x300] sm:$0xff] }
  0x30   :  { %v583_v29 = vrot.slane %v582_v21, 2  ;;  %v608_v30 = vadd.f32 %v607_v22, %v606_v14  ;;  %v571_v31 = vadd.f32 %v570_v23, %v569_v15  ;;  %v559_v36 = vrot.slane %v558_v28, 1  ;;  %v120_v1 = vld [vmem:[#allocation2 + $0x308] sm:$0xff]  ;;  %v94_v7 = vld [vmem:[#allocation2 + $0x238] sm:$0xff]  ;;  %v101_v8 = vld [vmem:[#allocation2 + $0x270] sm:$0xff] }
  0x31   :  { %v596_v32 = vrot.slane %v595_v24, 2  ;;  %v621_v33 = vadd.f32 %v620_v25, %v619_v17  ;;  %v633_v34 = vrot.slane %v632_v26, 4  ;;  %v1678_v48 = vadd.f32 %v546_v35, %v545_v27  ;;  %v113_v9 = vld [vmem:[#allocation2 + $0x2d0] sm:$0xff]  ;;  %v127_v10 = vld [vmem:[#allocation2 + $0x340] sm:$0xff]  ;;  %v128_v11 = vld [vmem:[#allocation2 + $0x348] sm:$0xff] }
  0x32   :  { %v584_v38 = vadd.f32 %v583_v29, %v582_v21  ;;  %v609_v37 = vrot.slane %v608_v30, 2  ;;  %v572_v41 = vrot.slane %v571_v31, 1  ;;  %v1680_v49 = vadd.f32 %v559_v36, %v558_v28  ;;  %v109_v16 = vld [vmem:[#allocation2 + $0x2b0] sm:$0xff]  ;;  %v135_v18 = vld [vmem:[#allocation2 + $0x380] sm:$0xff]  ;;  %v136_v19 = vld [vmem:[#allocation2 + $0x388] sm:$0xff] }
  0x33   :  { %v597_v42 = vadd.f32 %v596_v32, %v595_v24  ;;  %v622_v43 = vrot.slane %v621_v33, 2  ;;  %v634_v44 = vadd.f32 %v633_v34, %v632_v26  ;;  %v642_v4 = vadd.f32 %v1676_v5, %v91_v39  ;;  %v121_v17 = vld [vmem:[#allocation2 + $0x310] sm:$0xff]  ;;  %v102_v22 = vld [vmem:[#allocation2 + $0x278] sm:$0xff] }
  0x34   :  { %v585_v50 = vrot.slane %v584_v38, 1  ;;  %v610_v51 = vadd.f32 %v609_v37, %v608_v30  ;;  %v1682_v59 = vadd.f32 %v572_v41, %v571_v31  ;;  %v654_v6 = vadd.f32 %v1672_v52, %v98_v40  ;;  %v114_v23 = vld [vmem:[#allocation2 + $0x2d8] sm:$0xff]  ;;  %v129_v25 = vld [vmem:[#allocation2 + $0x350] sm:$0xff]  ;;  %v144_v31 = vld [vmem:[#allocation2 + $0x3c8] sm:$0xff] }
  0x35   :  { %v598_v60 = vrot.slane %v597_v42, 1  ;;  %v623_v61 = vadd.f32 %v622_v43, %v621_v33  ;;  %v635_v62 = vrot.slane %v634_v44, 2  ;;  %v667_v15 = vadd.f32 %v1674_v53, %v106_v47  ;;  %v122_v24 = vld [vmem:[#allocation2 + $0x318] sm:$0xff]  ;;  %v137_v30 = vld [vmem:[#allocation2 + $0x390] sm:$0xff]  ;;  %v143_v53 = vld [vmem:[#allocation2 + $0x3c0] sm:$0xff] }
  0x36   :  { %v1684_v2 = vadd.f32 %v585_v50, %v584_v38  ;;  %v611_v3 = vrot.slane %v610_v51, 1  ;;  %v643_v5 = vadd.f32 %v642_v4, %v92_v45  ;;  %v655_v21 = vadd.f32 %v654_v6, %v99_v46  ;;  %v110_v36 = vld [vmem:[#allocation2 + $0x2b8] sm:$0xff]  ;;  %v115_v38 = vld [vmem:[#allocation2 + $0x2e0] sm:$0xff]  ;;  %v145_v45 = vld [vmem:[#allocation2 + $0x3d0] sm:$0xff] }
  0x37   :  { %v1688_v12 = vadd.f32 %v598_v60, %v597_v42  ;;  %v624_v13 = vrot.slane %v623_v61, 1  ;;  %v636_v14 = vadd.f32 %v635_v62, %v634_v44  ;;  %v678_v52 = vadd.f32 %v112_v58, %v111_v57  ;;  %v130_v37 = vld [vmem:[#allocation2 + $0x358] sm:$0xff]  ;;  %v123_v43 = vld [vmem:[#allocation2 + $0x320] sm:$0xff]  ;;  %v117_v6 = vld [vmem:[#allocation2 + $0x2f0] sm:$0xff] }
  0x38   :  { %v1691_v20 = vadd.f32 %v611_v3, %v610_v51  ;;  %v668_v28 = vadd.f32 %v667_v15, %v107_v56  ;;  %v691_v29 = vadd.f32 %v120_v1, %v119_v0  ;;  %v644_v32 = vadd.f32 %v643_v5, %v93_v54  ;;  %v138_v44 = vld [vmem:[#allocation2 + $0x398] sm:$0xff]  ;;  %v116_v56 = vld [vmem:[#allocation2 + $0x2e8] sm:$0xff]  ;;  %v131_v54 = vld [vmem:[#allocation2 + $0x360] sm:$0xff] }
  0x39   :  { %v1693_v26 = vadd.f32 %v624_v13, %v623_v61  ;;  %v637_v27 = vrot.slane %v636_v14, 1  ;;  %v656_v33 = vadd.f32 %v655_v21, %v100_v55  ;;  %v679_v34 = vadd.f32 %v678_v52, %v113_v9  ;;  %v124_v61 = vld [vmem:[#allocation2 + $0x328] sm:$0xff]  ;;  %v139_v62 = vld [vmem:[#allocation2 + $0x3a0] sm:$0xff]  ;;  %v146_v0 = vld [vmem:[#allocation2 + $0x3d8] sm:$0xff] }
  0x3a   :  { %v704_v35 = vadd.f32 %v128_v11, %v127_v10  ;;  %v669_v40 = vadd.f32 %v668_v28, %v108_v63  ;;  %v692_v41 = vadd.f32 %v691_v29, %v121_v17  ;;  %v717_v42 = vadd.f32 %v136_v19, %v135_v18  ;;  %v132_v9 = vld [vmem:[#allocation2 + $0x368] sm:$0xff]  ;;  %v125_v13 = vld [vmem:[#allocation2 + $0x330] sm:$0xff]  ;;  %v147_v15 = vld [vmem:[#allocation2 + $0x3e0] sm:$0xff] }
  0x3b   :  { %v1695_v39 = vadd.f32 %v637_v27, %v636_v14  ;;  %v645_v46 = vadd.f32 %v644_v32, %v94_v7  ;;  %v657_v47 = vadd.f32 %v656_v33, %v101_v8  ;;  %v680_v50 = vadd.f32 %v679_v34, %v114_v23  ;;  %v140_v14 = vld [vmem:[#allocation2 + $0x3a8] sm:$0xff]  ;;  %v118_v5 = vld [vmem:[#allocation2 + $0x2f8] sm:$0xff]  ;;  %v133_v21 = vld [vmem:[#allocation2 + $0x370] sm:$0xff] }
  0x3c   :  { %v705_v51 = vadd.f32 %v704_v35, %v129_v25  ;;  %v670_v55 = vadd.f32 %v669_v40, %v109_v16  ;;  %v693_v57 = vadd.f32 %v692_v41, %v122_v24  ;;  %v718_v58 = vadd.f32 %v717_v42, %v137_v30  ;;  %v126_v25 = vld [vmem:[#allocation2 + $0x338] sm:$0xff]  ;;  %v141_v27 = vld [vmem:[#allocation2 + $0x3b0] sm:$0xff]  ;;  %v148_v28 = vld [vmem:[#allocation2 + $0x3e8] sm:$0xff] }
  0x3d   :  { %v730_v60 = vadd.f32 %v144_v31, %v143_v53  ;;  %v646_v1 = vrot.slane %v645_v46, 4  ;;  %v658_v63 = vadd.f32 %v657_v47, %v102_v22  ;;  %v681_v3 = vadd.f32 %v680_v50, %v115_v38  ;;  %v134_v32 = vld [vmem:[#allocation2 + $0x378] sm:$0xff] }
  0x3e   :  { %v706_v4 = vadd.f32 %v705_v51, %v130_v37  ;;  %v671_v10 = vadd.f32 %v670_v55, %v110_v36  ;;  %v694_v7 = vadd.f32 %v693_v57, %v123_v43  ;;  %v719_v8 = vadd.f32 %v718_v58, %v138_v44  ;;  %v142_v38 = vld [vmem:[#allocation2 + $0x3b8] sm:$0xff]  ;;  %v149_v37 = vld [vmem:[#allocation2 + $0x3f0] sm:$0xff]  ;;  %v151_v57 = vld [vmem:[#allocation2 + $0x400] sm:$0xff] }
  0x3f   :  { %v731_v11 = vadd.f32 %v730_v60, %v145_v45  ;;  %v647_v16 = vadd.f32 %v646_v1, %v645_v46  ;;  %v659_v17 = vrot.slane %v658_v63, 4  ;;  %v682_v18 = vadd.f32 %v681_v3, %v116_v56  ;;  %v150_v50 = vld [vmem:[#allocation2 + $0x3f8] sm:$0xff]  ;;  %v152_v58 = vld [vmem:[#allocation2 + $0x408] sm:$0xff] }
  0x40   :  { %v707_v19 = vadd.f32 %v706_v4, %v131_v54  ;;  %v672_v52 = vrot.slane %v671_v10, 4  ;;  %v695_v23 = vadd.f32 %v694_v7, %v124_v61  ;;  %v720_v22 = vadd.f32 %v719_v8, %v139_v62 }
  0x41   :  { %v732_v24 = vadd.f32 %v731_v11, %v146_v0  ;;  %v648_v29 = vrot.slane %v647_v16, 2  ;;  %v660_v30 = vadd.f32 %v659_v17, %v658_v63  ;;  %v683_v53 = vadd.f32 %v682_v18, %v117_v6  ;;  %v153_v6 = vld [vmem:[#allocation2 + $0x410] sm:$0xff] }
  0x42   :  { %v708_v31 = vadd.f32 %v707_v19, %v132_v9  ;;  %v673_v33 = vadd.f32 %v672_v52, %v671_v10  ;;  %v696_v34 = vadd.f32 %v695_v23, %v125_v13  ;;  %v721_v35 = vadd.f32 %v720_v22, %v140_v14  ;;  %v159_v9 = vld [vmem:[#allocation2 + $0x440] sm:$0xff]  ;;  %v160_v10 = vld [vmem:[#allocation2 + $0x448] sm:$0xff] }
  0x43   :  { %v733_v36 = vadd.f32 %v732_v24, %v147_v15  ;;  %v649_v40 = vadd.f32 %v648_v29, %v647_v16  ;;  %v661_v41 = vrot.slane %v660_v30, 2  ;;  %v684_v42 = vadd.f32 %v683_v53, %v118_v5  ;;  %v167_v14 = vld [vmem:[#allocation2 + $0x480] sm:$0xff]  ;;  %v168_v15 = vld [vmem:[#allocation2 + $0x488] sm:$0xff]  ;;  %v154_v5 = vld [vmem:[#allocation2 + $0x418] sm:$0xff] }
  0x44   :  { %v709_v43 = vadd.f32 %v708_v31, %v133_v21  ;;  %v674_v44 = vrot.slane %v673_v33, 2  ;;  %v697_v45 = vadd.f32 %v696_v34, %v126_v25  ;;  %v722_v46 = vadd.f32 %v721_v35, %v141_v27  ;;  %v161_v21 = vld [vmem:[#allocation2 + $0x450] sm:$0xff]  ;;  %v155_v53 = vld [vmem:[#allocation2 + $0x420] sm:$0xff]  ;;  %v162_v31 = vld [vmem:[#allocation2 + $0x458] sm:$0xff] }
  0x45   :  { %v734_v47 = vadd.f32 %v733_v36, %v148_v28  ;;  %v650_v51 = vrot.slane %v649_v40, 1  ;;  %v662_v56 = vadd.f32 %v661_v41, %v660_v30  ;;  %v685_v54 = vrot.slane %v684_v42, 4  ;;  %v169_v25 = vld [vmem:[#allocation2 + $0x490] sm:$0xff]  ;;  %v156_v36 = vld [vmem:[#allocation2 + $0x428] sm:$0xff] }
  0x46   :  { %v710_v55 = vadd.f32 %v709_v43, %v134_v32  ;;  %v675_v60 = vadd.f32 %v674_v44, %v673_v33  ;;  %v698_v61 = vrot.slane %v697_v45, 4  ;;  %v723_v62 = vadd.f32 %v722_v46, %v142_v38  ;;  %v163_v38 = vld [vmem:[#allocation2 + $0x460] sm:$0xff]  ;;  %v157_v44 = vld [vmem:[#allocation2 + $0x430] sm:$0xff] }
  0x47   :  { %v735_v0 = vadd.f32 %v734_v47, %v149_v37  ;;  %v1697_v1 = vadd.f32 %v650_v51, %v649_v40  ;;  %v663_v63 = vrot.slane %v662_v56, 1  ;;  %v686_v3 = vadd.f32 %v685_v54, %v684_v42  ;;  %v170_v37 = vld [vmem:[#allocation2 + $0x498] sm:$0xff]  ;;  %v171_v46 = vld [vmem:[#allocation2 + $0x4a0] sm:$0xff] }
  0x48   :  { %v711_v4 = vrot.slane %v710_v55, 4  ;;  %v676_v7 = vrot.slane %v675_v60, 1  ;;  %v699_v8 = vadd.f32 %v698_v61, %v697_v45  ;;  %v724_v11 = vrot.slane %v723_v62, 4  ;;  %v164_v45 = vld [vmem:[#allocation2 + $0x468] sm:$0xff]  ;;  %v175_v47 = vld [vmem:[#allocation2 + $0x4c0] sm:$0xff] }
  0x49   :  { %v736_v13 = vadd.f32 %v735_v0, %v150_v50  ;;  %v1699_v16 = vadd.f32 %v663_v63, %v662_v56  ;;  %v687_v17 = vrot.slane %v686_v3, 2  ;;  %v743_v19 = vadd.f32 %v152_v58, %v151_v57  ;;  %v176_v50 = vld [vmem:[#allocation2 + $0x4c8] sm:$0xff]  ;;  %v183_v58 = vld [vmem:[#allocation2 + $0x500] sm:$0xff] }
  0x4a   :  { %v712_v18 = vadd.f32 %v711_v4, %v710_v55  ;;  %v1701_v52 = vadd.f32 %v676_v7, %v675_v60  ;;  %v700_v23 = vrot.slane %v699_v8, 2  ;;  %v725_v22 = vadd.f32 %v724_v11, %v723_v62  ;;  %v172_v57 = vld [vmem:[#allocation2 + $0x4a8] sm:$0xff]  ;;  %v165_v4 = vld [vmem:[#allocation2 + $0x470] sm:$0xff] }
  0x4b   :  { %v737_v24 = vrot.slane %v736_v13, 4  ;;  %v688_v27 = vadd.f32 %v687_v17, %v686_v3  ;;  %v744_v29 = vadd.f32 %v743_v19, %v153_v6  ;;  %v756_v30 = vadd.f32 %v160_v10, %v159_v9  ;;  %v184_v60 = vld [vmem:[#allocation2 + $0x508] sm:$0xff]  ;;  %v158_v3 = vld [vmem:[#allocation2 + $0x438] sm:$0xff]  ;;  %v177_v6 = vld [vmem:[#allocation2 + $0x4d0] sm:$0xff] }
  0x4c   :  { %v713_v28 = vrot.slane %v712_v18, 2  ;;  %v701_v32 = vadd.f32 %v700_v23, %v699_v8  ;;  %v726_v33 = vrot.slane %v725_v22, 2  ;;  %v769_v35 = vadd.f32 %v168_v15, %v167_v14  ;;  %v191_v9 = vld [vmem:[#allocation2 + $0x540] sm:$0xff]  ;;  %v192_v10 = vld [vmem:[#allocation2 + $0x548] sm:$0xff]  ;;  %v173_v14 = vld [vmem:[#allocation2 + $0x4b0] sm:$0xff] }
  0x4d   :  { %v738_v34 = vadd.f32 %v737_v24, %v736_v13  ;;  %v689_v40 = vrot.slane %v688_v27, 1  ;;  %v745_v42 = vadd.f32 %v744_v29, %v154_v5  ;;  %v757_v43 = vadd.f32 %v756_v30, %v161_v21  ;;  %v185_v15 = vld [vmem:[#allocation2 + $0x510] sm:$0xff]  ;;  %v199_v17 = vld [vmem:[#allocation2 + $0x580] sm:$0xff]  ;;  %v178_v24 = vld [vmem:[#allocation2 + $0x4d8] sm:$0xff] }
  0x4e   :  { %v714_v41 = vadd.f32 %v713_v28, %v712_v18  ;;  %v702_v51 = vrot.slane %v701_v32, 1  ;;  %v727_v56 = vadd.f32 %v726_v33, %v725_v22  ;;  %v770_v55 = vadd.f32 %v769_v35, %v169_v25  ;;  %v200_v18 = vld [vmem:[#allocation2 + $0x588] sm:$0xff]  ;;  %v166_v22 = vld [vmem:[#allocation2 + $0x478] sm:$0xff] }
  0x4f   :  { %v739_v54 = vrot.slane %v738_v34, 2  ;;  %v1703_v61 = vadd.f32 %v689_v40, %v688_v27  ;;  %v746_v0 = vadd.f32 %v745_v42, %v155_v53  ;;  %v758_v63 = vadd.f32 %v757_v43, %v162_v31  ;;  %v186_v25 = vld [vmem:[#allocation2 + $0x518] sm:$0xff]  ;;  %v193_v27 = vld [vmem:[#allocation2 + $0x550] sm:$0xff]  ;;  %v208_v33 = vld [vmem:[#allocation2 + $0x5c8] sm:$0xff] }
  0x50   :  { %v715_v62 = vrot.slane %v714_v41, 1  ;;  %v1705_v7 = vadd.f32 %v702_v51, %v701_v32  ;;  %v728_v8 = vrot.slane %v727_v56, 1  ;;  %v771_v13 = vadd.f32 %v770_v55, %v170_v37  ;;  %v201_v31 = vld [vmem:[#allocation2 + $0x590] sm:$0xff]  ;;  %v207_v32 = vld [vmem:[#allocation2 + $0x5c0] sm:$0xff] }
  0x51   :  { %v740_v11 = vadd.f32 %v739_v54, %v738_v34  ;;  %v747_v5 = vadd.f32 %v746_v0, %v156_v36  ;;  %v759_v21 = vadd.f32 %v758_v63, %v163_v38  ;;  %v782_v23 = vadd.f32 %v176_v50, %v175_v47  ;;  %v179_v36 = vld [vmem:[#allocation2 + $0x4e0] sm:$0xff]  ;;  %v194_v38 = vld [vmem:[#allocation2 + $0x558] sm:$0xff]  ;;  %v209_v54 = vld [vmem:[#allocation2 + $0x5d0] sm:$0xff] }
  0x52   :  { %v1707_v19 = vadd.f32 %v715_v62, %v714_v41  ;;  %v1709_v28 = vadd.f32 %v728_v8, %v727_v56  ;;  %v772_v30 = vadd.f32 %v771_v13, %v171_v46  ;;  %v795_v53 = vadd.f32 %v184_v60, %v183_v58  ;;  %v174_v41 = vld [vmem:[#allocation2 + $0x4b8] sm:$0xff]  ;;  %v187_v51 = vld [vmem:[#allocation2 + $0x520] sm:$0xff]  ;;  %v180_v62 = vld [vmem:[#allocation2 + $0x4e8] sm:$0xff] }
  0x53   :  { %v741_v29 = vrot.slane %v740_v11, 1  ;;  %v748_v34 = vadd.f32 %v747_v5, %v157_v44  ;;  %v760_v35 = vadd.f32 %v759_v21, %v164_v45  ;;  %v783_v37 = vadd.f32 %v782_v23, %v177_v6  ;;  %v202_v56 = vld [vmem:[#allocation2 + $0x598] sm:$0xff]  ;;  %v195_v44 = vld [vmem:[#allocation2 + $0x560] sm:$0xff]  ;;  %v189_v23 = vld [vmem:[#allocation2 + $0x530] sm:$0xff] }
  0x54   :  { %v808_v40 = vadd.f32 %v192_v10, %v191_v9  ;;  %v773_v43 = vadd.f32 %v772_v30, %v172_v57  ;;  %v796_v47 = vadd.f32 %v795_v53, %v185_v15  ;;  %v821_v50 = vadd.f32 %v200_v18, %v199_v17  ;;  %v188_v9 = vld [vmem:[#allocation2 + $0x528] sm:$0xff]  ;;  %v203_v10 = vld [vmem:[#allocation2 + $0x5a0] sm:$0xff]  ;;  %v210_v8 = vld [vmem:[#allocation2 + $0x5d8] sm:$0xff] }
  0x55   :  { %v1711_v42 = vadd.f32 %v741_v29, %v740_v11  ;;  %v749_v46 = vadd.f32 %v748_v34, %v158_v3  ;;  %v761_v55 = vadd.f32 %v760_v35, %v165_v4  ;;  %v784_v58 = vadd.f32 %v783_v37, %v178_v24  ;;  %v181_v17 = vld [vmem:[#allocation2 + $0x4f0] sm:$0xff]  ;;  %v196_v18 = vld [vmem:[#allocation2 + $0x568] sm:$0xff]  ;;  %v182_v53 = vld [vmem:[#allocation2 + $0x4f8] sm:$0xff] }
  0x56   :  { %v809_v60 = vadd.f32 %v808_v40, %v193_v27  ;;  %v774_v45 = vadd.f32 %v773_v43, %v173_v14  ;;  %v797_v0 = vadd.f32 %v796_v47, %v186_v25  ;;  %v822_v63 = vadd.f32 %v821_v50, %v201_v31  ;;  %v204_v24 = vld [vmem:[#allocation2 + $0x5a8] sm:$0xff]  ;;  %v211_v27 = vld [vmem:[#allocation2 + $0x5e0] sm:$0xff]  ;;  %v197_v31 = vld [vmem:[#allocation2 + $0x570] sm:$0xff] }
  0x57   :  { %v834_v6 = vadd.f32 %v208_v33, %v207_v32  ;;  %v750_v11 = vrot.slane %v749_v46, 4  ;;  %v762_v57 = vadd.f32 %v761_v55, %v166_v22  ;;  %v785_v13 = vadd.f32 %v784_v58, %v179_v36  ;;  %v190_v35 = vld [vmem:[#allocation2 + $0x538] sm:$0xff]  ;;  %v205_v37 = vld [vmem:[#allocation2 + $0x5b0] sm:$0xff]  ;;  %v212_v40 = vld [vmem:[#allocation2 + $0x5e8] sm:$0xff] }
  0x58   :  { %v810_v15 = vadd.f32 %v809_v60, %v194_v38  ;;  %v775_v5 = vadd.f32 %v774_v45, %v174_v41  ;;  %v798_v3 = vadd.f32 %v797_v0, %v187_v51  ;;  %v823_v4 = vadd.f32 %v822_v63, %v202_v56  ;;  %v198_v47 = vld [vmem:[#allocation2 + $0x578] sm:$0xff]  ;;  %v213_v55 = vld [vmem:[#allocation2 + $0x5f0] sm:$0xff] }
  0x59   :  { %v835_v21 = vadd.f32 %v834_v6, %v209_v54  ;;  %v751_v14 = vadd.f32 %v750_v11, %v749_v46  ;;  %v763_v25 = vrot.slane %v762_v57, 4  ;;  %v786_v29 = vadd.f32 %v785_v13, %v180_v62  ;;  %v206_v46 = vld [vmem:[#allocation2 + $0x5b8] sm:$0xff]  ;;  %v215_v13 = vld [vmem:[#allocation2 + $0x600] sm:$0xff] }
  0x5a   :  { %v811_v30 = vadd.f32 %v810_v15, %v195_v44  ;;  %v776_v32 = vrot.slane %v775_v5, 4  ;;  %v799_v33 = vadd.f32 %v798_v3, %v188_v9  ;;  %v824_v22 = vadd.f32 %v823_v4, %v203_v10  ;;  %v214_v9 = vld [vmem:[#allocation2 + $0x5f8] sm:$0xff]  ;;  %v216_v15 = vld [vmem:[#allocation2 + $0x608] sm:$0xff] }
  0x5b   :  { %v836_v34 = vadd.f32 %v835_v21, %v210_v8  ;;  %v752_v41 = vrot.slane %v751_v14, 2  ;;  %v764_v36 = vadd.f32 %v763_v25, %v762_v57  ;;  %v787_v38 = vadd.f32 %v786_v29, %v181_v17  ;;  %v224_v25 = vld [vmem:[#allocation2 + $0x648] sm:$0xff] }
  0x5c   :  { %v812_v43 = vadd.f32 %v811_v30, %v196_v18  ;;  %v777_v50 = vadd.f32 %v776_v32, %v775_v5  ;;  %v800_v51 = vadd.f32 %v799_v33, %v189_v23  ;;  %v825_v56 = vadd.f32 %v824_v22, %v204_v24  ;;  %v231_v32 = vld [vmem:[#allocation2 + $0x680] sm:$0xff]  ;;  %v232_v33 = vld [vmem:[#allocation2 + $0x688] sm:$0xff] }
  0x5d   :  { %v837_v54 = vadd.f32 %v836_v34, %v211_v27  ;;  %v753_v58 = vadd.f32 %v752_v41, %v751_v14  ;;  %v765_v60 = vrot.slane %v764_v36, 2  ;;  %v788_v62 = vadd.f32 %v787_v38, %v182_v53  ;;  %v217_v27 = vld [vmem:[#allocation2 + $0x610] sm:$0xff]  ;;  %v223_v14 = vld [vmem:[#allocation2 + $0x640] sm:$0xff] }
  0x5e   :  { %v813_v44 = vadd.f32 %v812_v43, %v197_v31  ;;  %v778_v45 = vrot.slane %v777_v50, 2  ;;  %v801_v0 = vadd.f32 %v800_v51, %v190_v35  ;;  %v826_v63 = vadd.f32 %v825_v56, %v205_v37  ;;  %v225_v41 = vld [vmem:[#allocation2 + $0x650] sm:$0xff] }
  0x5f   :  { %v838_v6 = vadd.f32 %v837_v54, %v212_v40  ;;  %v754_v10 = vrot.slane %v753_v58, 1  ;;  %v766_v8 = vadd.f32 %v765_v60, %v764_v36  ;;  %v789_v11 = vrot.slane %v788_v62, 4  ;;  %v218_v40 = vld [vmem:[#allocation2 + $0x618] sm:$0xff] }
  0x60   :  { %v814_v57 = vadd.f32 %v813_v44, %v198_v47  ;;  %v779_v17 = vadd.f32 %v778_v45, %v777_v50  ;;  %v802_v18 = vrot.slane %v801_v0, 4  ;;  %v827_v5 = vadd.f32 %v826_v63, %v206_v46  ;;  %v233_v50 = vld [vmem:[#allocation2 + $0x690] sm:$0xff]  ;;  %v227_v63 = vld [vmem:[#allocation2 + $0x660] sm:$0xff] }
  0x61   :  { %v839_v3 = vadd.f32 %v838_v6, %v213_v55  ;;  %v1713_v4 = vadd.f32 %v754_v10, %v753_v58  ;;  %v767_v21 = vrot.slane %v766_v8, 1  ;;  %v790_v23 = vadd.f32 %v789_v11, %v788_v62  ;;  %v219_v55 = vld [vmem:[#allocation2 + $0x620] sm:$0xff]  ;;  %v226_v58 = vld [vmem:[#allocation2 + $0x658] sm:$0xff] }
  0x62   :  { %v815_v24 = vrot.slane %v814_v57, 4  ;;  %v780_v29 = vrot.slane %v779_v17, 1  ;;  %v803_v30 = vadd.f32 %v802_v18, %v801_v0  ;;  %v828_v53 = vrot.slane %v827_v5, 4  ;;  %v220_v0 = vld [vmem:[#allocation2 + $0x628] sm:$0xff]  ;;  %v234_v6 = vld [vmem:[#allocation2 + $0x698] sm:$0xff] }
  0x63   :  { %v840_v31 = vadd.f32 %v839_v3, %v214_v9  ;;  %v1715_v22 = vadd.f32 %v767_v21, %v766_v8  ;;  %v791_v34 = vrot.slane %v790_v23, 2  ;;  %v847_v37 = vadd.f32 %v216_v15, %v215_v13  ;;  %v228_v13 = vld [vmem:[#allocation2 + $0x668] sm:$0xff]  ;;  %v235_v15 = vld [vmem:[#allocation2 + $0x6a0] sm:$0xff] }
  0x64   :  { %v816_v35 = vadd.f32 %v815_v24, %v814_v57  ;;  %v1717_v36 = vadd.f32 %v780_v29, %v779_v17  ;;  %v804_v38 = vrot.slane %v803_v30, 2  ;;  %v829_v43 = vadd.f32 %v828_v53, %v827_v5  ;;  %v221_v57 = vld [vmem:[#allocation2 + $0x630] sm:$0xff]  ;;  %v239_v17 = vld [vmem:[#allocation2 + $0x6c0] sm:$0xff]  ;;  %v240_v18 = vld [vmem:[#allocation2 + $0x6c8] sm:$0xff] }
  0x65   :  { %v841_v47 = vrot.slane %v840_v31, 4  ;;  %v792_v51 = vadd.f32 %v791_v34, %v790_v23  ;;  %v848_v54 = vadd.f32 %v847_v37, %v217_v27  ;;  %v860_v46 = vadd.f32 %v224_v25, %v223_v14  ;;  %v236_v24 = vld [vmem:[#allocation2 + $0x6a8] sm:$0xff]  ;;  %v247_v27 = vld [vmem:[#allocation2 + $0x700] sm:$0xff] }
  0x66   :  { %v817_v56 = vrot.slane %v816_v35, 2  ;;  %v805_v60 = vadd.f32 %v804_v38, %v803_v30  ;;  %v830_v62 = vrot.slane %v829_v43, 2  ;;  %v873_v45 = vadd.f32 %v232_v33, %v231_v32  ;;  %v248_v14 = vld [vmem:[#allocation2 + $0x708] sm:$0xff]  ;;  %v229_v32 = vld [vmem:[#allocation2 + $0x670] sm:$0xff]  ;;  %v255_v34 = vld [vmem:[#allocation2 + $0x740] sm:$0xff] }
  0x67   :  { %v842_v44 = vadd.f32 %v841_v47, %v840_v31  ;;  %v793_v9 = vrot.slane %v792_v51, 1  ;;  %v849_v8 = vadd.f32 %v848_v54, %v218_v40  ;;  %v861_v11 = vadd.f32 %v860_v46, %v225_v41  ;;  %v222_v31 = vld [vmem:[#allocation2 + $0x638] sm:$0xff]  ;;  %v241_v33 = vld [vmem:[#allocation2 + $0x6d0] sm:$0xff] }
  0x68   :  { %v818_v10 = vadd.f32 %v817_v56, %v816_v35  ;;  %v806_v5 = vrot.slane %v805_v60, 1  ;;  %v831_v3 = vadd.f32 %v830_v62, %v829_v43  ;;  %v874_v23 = vadd.f32 %v873_v45, %v233_v50  ;;  %v256_v35 = vld [vmem:[#allocation2 + $0x748] sm:$0xff]  ;;  %v237_v43 = vld [vmem:[#allocation2 + $0x6b0] sm:$0xff]  ;;  %v263_v50 = vld [vmem:[#allocation2 + $0x780] sm:$0xff] }
  0x69   :  { %v843_v21 = vrot.slane %v842_v44, 2  ;;  %v1719_v25 = vadd.f32 %v793_v9, %v792_v51  ;;  %v850_v30 = vadd.f32 %v849_v8, %v219_v55  ;;  %v862_v53 = vadd.f32 %v861_v11, %v226_v58  ;;  %v249_v47 = vld [vmem:[#allocation2 + $0x710] sm:$0xff]  ;;  %v264_v56 = vld [vmem:[#allocation2 + $0x788] sm:$0xff]  ;;  %v230_v58 = vld [vmem:[#allocation2 + $0x678] sm:$0xff] }
  0x6a   :  { %v819_v29 = vrot.slane %v818_v10, 1  ;;  %v1721_v37 = vadd.f32 %v806_v5, %v805_v60  ;;  %v832_v40 = vrot.slane %v831_v3, 1  ;;  %v875_v38 = vadd.f32 %v874_v23, %v234_v6  ;;  %v242_v62 = vld [vmem:[#allocation2 + $0x6d8] sm:$0xff]  ;;  %v257_v9 = vld [vmem:[#allocation2 + $0x750] sm:$0xff]  ;;  %v271_v6 = vld [vmem:[#allocation2 + $0x7c0] sm:$0xff] }
  0x6b   :  { %2081 = vst [vmem:[#allocation8_spill] sm:$0xff] %v1719_v25  ;;  %v844_v41 = vadd.f32 %v843_v21, %v842_v44  ;;  %v851_v51 = vadd.f32 %v850_v30, %v220_v0  ;;  %v863_v46 = vadd.f32 %v862_v53, %v227_v63  ;;  %v886_v55 = vadd.f32 %v240_v18, %v239_v17  ;;  %v250_v45 = vld [vmem:[#allocation2 + $0x718] sm:$0xff]  ;;  %v265_v44 = vld [vmem:[#allocation2 + $0x790] sm:$0xff]  ;;  %v272_v21 = vld [vmem:[#allocation2 + $0x7c8] sm:$0xff] }
  0x6c   :  { %2082 = vst [vmem:[#allocation9_spill] sm:$0xff] %v1721_v37  ;;  %v1723_v54 = vadd.f32 %v819_v29, %v818_v10  ;;  %v1725_v8 = vadd.f32 %v832_v40, %v831_v3  ;;  %v876_v11 = vadd.f32 %v875_v38, %v235_v15  ;;  %v899_v5 = vadd.f32 %v248_v14, %v247_v27  ;;  %v238_v29 = vld [vmem:[#allocation2 + $0x6b8] sm:$0xff]  ;;  %v243_v0 = vld [vmem:[#allocation2 + $0x6e0] sm:$0xff] }
  0x6d   :  { %v845_v60 = vrot.slane %v844_v41, 1  ;;  %v852_v23 = vadd.f32 %v851_v51, %v221_v57  ;;  %v864_v37 = vadd.f32 %v863_v46, %v228_v13  ;;  %v887_v25 = vadd.f32 %v886_v55, %v241_v33  ;;  %v258_v63 = vld [vmem:[#allocation2 + $0x758] sm:$0xff]  ;;  %v251_v3 = vld [vmem:[#allocation2 + $0x720] sm:$0xff]  ;;  %v252_v51 = vld [vmem:[#allocation2 + $0x728] sm:$0xff] }
  0x6e   :  { %2083 = vst [vmem:[#allocation10_spill] sm:$0xff] %v1723_v54  ;;  %2084 = vst [vmem:[#allocation11_spill] sm:$0xff] %v1725_v8  ;;  %v912_v10 = vadd.f32 %v256_v35, %v255_v34  ;;  %v877_v18 = vadd.f32 %v876_v11, %v236_v24  ;;  %v900_v30 = vadd.f32 %v899_v5, %v249_v47  ;;  %v266_v40 = vld [vmem:[#allocation2 + $0x798] sm:$0xff]  ;;  %v273_v8 = vld [vmem:[#allocation2 + $0x7d0] sm:$0xff] }
  0x6f   :  { %v1727_v17 = vadd.f32 %v845_v60, %v844_v41  ;;  %v925_v53 = vadd.f32 %v264_v56, %v263_v50  ;;  %v853_v15 = vadd.f32 %v852_v23, %v222_v31  ;;  %v865_v27 = vadd.f32 %v864_v37, %v229_v32  ;;  %v244_v54 = vld [vmem:[#allocation2 + $0x6e8] sm:$0xff]  ;;  %v259_v57 = vld [vmem:[#allocation2 + $0x760] sm:$0xff]  ;;  %v274_v41 = vld [vmem:[#allocation2 + $0x7d8] sm:$0xff] }
  0x70   :  { %v888_v14 = vadd.f32 %v887_v25, %v242_v62  ;;  %v913_v38 = vadd.f32 %v912_v10, %v257_v9  ;;  %v878_v13 = vadd.f32 %v877_v18, %v237_v43  ;;  %v901_v33 = vadd.f32 %v900_v30, %v250_v45  ;;  %v267_v46 = vld [vmem:[#allocation2 + $0x7a0] sm:$0xff]  ;;  %v245_v56 = vld [vmem:[#allocation2 + $0x6f0] sm:$0xff]  ;;  %v260_v60 = vld [vmem:[#allocation2 + $0x768] sm:$0xff] }
  0x71   :  { %2085 = vst [vmem:[#allocation12_spill] sm:$0xff] %v1727_v17  ;;  %v926_v34 = vadd.f32 %v925_v53, %v265_v44  ;;  %v938_v35 = vadd.f32 %v272_v21, %v271_v6  ;;  %v854_v55 = vrot.slane %v853_v15, 4  ;;  %v866_v24 = vadd.f32 %v865_v27, %v230_v58  ;;  %v253_v37 = vld [vmem:[#allocation2 + $0x730] sm:$0xff]  ;;  %v268_v62 = vld [vmem:[#allocation2 + $0x7a8] sm:$0xff]  ;;  %v275_v9 = vld [vmem:[#allocation2 + $0x7e0] sm:$0xff] }
  0x72   :  { %v889_v47 = vadd.f32 %v888_v14, %v243_v0  ;;  %v914_v50 = vadd.f32 %v913_v38, %v258_v63  ;;  %v879_v11 = vadd.f32 %v878_v13, %v238_v29  ;;  %v902_v31 = vadd.f32 %v901_v33, %v251_v3  ;;  %v246_v6 = vld [vmem:[#allocation2 + $0x6f8] sm:$0xff]  ;;  %v261_v21 = vld [vmem:[#allocation2 + $0x770] sm:$0xff]  ;;  %v276_v30 = vld [vmem:[#allocation2 + $0x7e8] sm:$0xff] }
  0x73   :  { %v927_v32 = vadd.f32 %v926_v34, %v266_v40  ;;  %v939_v25 = vadd.f32 %v938_v35, %v273_v8  ;;  %v855_v43 = vadd.f32 %v854_v55, %v853_v15  ;;  %v867_v45 = vrot.slane %v866_v24, 4  ;;  %v254_v63 = vld [vmem:[#allocation2 + $0x738] sm:$0xff]  ;;  %v269_v18 = vld [vmem:[#allocation2 + $0x7b0] sm:$0xff] }
  0x74   :  { %v890_v5 = vadd.f32 %v889_v47, %v244_v54  ;;  %v915_v44 = vadd.f32 %v914_v50, %v259_v57  ;;  %v880_v23 = vrot.slane %v879_v11, 4  ;;  %v903_v10 = vadd.f32 %v902_v31, %v252_v51  ;;  %v262_v40 = vld [vmem:[#allocation2 + $0x778] sm:$0xff]  ;;  %v277_v57 = vld [vmem:[#allocation2 + $0x7f0] sm:$0xff]  ;;  %v279_v31 = vld [vmem:[#allocation2 + $0x800] sm:$0xff] }
  0x75   :  { %v928_v58 = vadd.f32 %v927_v32, %v267_v46  ;;  %v940_v0 = vadd.f32 %v939_v25, %v274_v41  ;;  %v856_v29 = vrot.slane %v855_v43, 2  ;;  %v868_v53 = vadd.f32 %v867_v45, %v866_v24  ;;  %v270_v54 = vld [vmem:[#allocation2 + $0x7b8] sm:$0xff] }
  0x76   :  { %v891_v3 = vadd.f32 %v890_v5, %v245_v56  ;;  %v916_v8 = vadd.f32 %v915_v44, %v260_v60  ;;  %v881_v27 = vadd.f32 %v880_v23, %v879_v11  ;;  %v904_v14 = vadd.f32 %v903_v10, %v253_v37  ;;  %v278_v47 = vld [vmem:[#allocation2 + $0x7f8] sm:$0xff]  ;;  %v280_v11 = vld [vmem:[#allocation2 + $0x808] sm:$0xff]  ;;  %v281_v44 = vld [vmem:[#allocation2 + $0x810] sm:$0xff] }
  0x77   :  { %v929_v15 = vadd.f32 %v928_v58, %v268_v62  ;;  %v941_v38 = vadd.f32 %v940_v0, %v275_v9  ;;  %v857_v13 = vadd.f32 %v856_v29, %v855_v43  ;;  %v869_v33 = vrot.slane %v868_v53, 2 }
  0x78   :  { %v892_v34 = vadd.f32 %v891_v3, %v246_v6  ;;  %v917_v35 = vadd.f32 %v916_v8, %v261_v21  ;;  %v882_v51 = vrot.slane %v881_v27, 2  ;;  %v905_v46 = vadd.f32 %v904_v14, %v254_v63  ;;  %v287_v6 = vld [vmem:[#allocation2 + $0x840] sm:$0xff]  ;;  %v288_v21 = vld [vmem:[#allocation2 + $0x848] sm:$0xff]  ;;  %v282_v8 = vld [vmem:[#allocation2 + $0x818] sm:$0xff] }
  0x79   :  { %v930_v41 = vadd.f32 %v929_v15, %v269_v18  ;;  %v942_v55 = vadd.f32 %v941_v38, %v276_v30  ;;  %v858_v50 = vrot.slane %v857_v13, 1  ;;  %v870_v24 = vadd.f32 %v869_v33, %v868_v53  ;;  %v295_v63 = vld [vmem:[#allocation2 + $0x880] sm:$0xff]  ;;  %v296_v18 = vld [vmem:[#allocation2 + $0x888] sm:$0xff] }
  0x7a   :  { %v893_v56 = vrot.slane %v892_v34, 4  ;;  %v918_v60 = vadd.f32 %v917_v35, %v262_v40  ;;  %v883_v32 = vadd.f32 %v882_v51, %v881_v27  ;;  %v906_v25 = vrot.slane %v905_v46, 4  ;;  %v289_v40 = vld [vmem:[#allocation2 + $0x850] sm:$0xff]  ;;  %v283_v35 = vld [vmem:[#allocation2 + $0x820] sm:$0xff]  ;;  %v290_v51 = vld [vmem:[#allocation2 + $0x858] sm:$0xff] }
  0x7b   :  { %v931_v37 = vadd.f32 %v930_v41, %v270_v54  ;;  %v943_v62 = vadd.f32 %v942_v55, %v277_v57  ;;  %v1729_v9 = vadd.f32 %v858_v50, %v857_v13  ;;  %v871_v43 = vrot.slane %v870_v24, 1  ;;  %v297_v54 = vld [vmem:[#allocation2 + $0x890] sm:$0xff]  ;;  %v284_v50 = vld [vmem:[#allocation2 + $0x828] sm:$0xff] }
  0x7c   :  { %v894_v45 = vadd.f32 %v893_v56, %v892_v34  ;;  %v919_v5 = vrot.slane %v918_v60, 4  ;;  %v884_v23 = vrot.slane %v883_v32, 1  ;;  %v907_v10 = vadd.f32 %v906_v25, %v905_v46  ;;  %v298_v56 = vld [vmem:[#allocation2 + $0x898] sm:$0xff]  ;;  %v285_v25 = vld [vmem:[#allocation2 + $0x830] sm:$0xff] }
  0x7d   :  { %2086 = vst [vmem:[#allocation13_spill] sm:$0xff] %v1729_v9  ;;  %v932_v58 = vrot.slane %v931_v37, 4  ;;  %v944_v0 = vadd.f32 %v943_v62, %v278_v47  ;;  %v1731_v30 = vadd.f32 %v871_v43, %v870_v24  ;;  %v951_v3 = vadd.f32 %v280_v11, %v279_v31  ;;  %v291_v24 = vld [vmem:[#allocation2 + $0x860] sm:$0xff] }
  0x7e   :  { %v895_v29 = vrot.slane %v894_v45, 2  ;;  %v920_v53 = vadd.f32 %v919_v5, %v918_v60  ;;  %v1733_v27 = vadd.f32 %v884_v23, %v883_v32  ;;  %v908_v14 = vrot.slane %v907_v10, 2  ;;  %v299_v62 = vld [vmem:[#allocation2 + $0x8a0] sm:$0xff]  ;;  %v300_v23 = vld [vmem:[#allocation2 + $0x8a8] sm:$0xff] }
  0x7f   :  { %2087 = vst [vmem:[#allocation14_spill] sm:$0xff] %v1731_v30  ;;  %v933_v15 = vadd.f32 %v932_v58, %v931_v37  ;;  %v945_v38 = vrot.slane %v944_v0, 4  ;;  %v952_v33 = vadd.f32 %v951_v3, %v281_v44  ;;  %v964_v34 = vadd.f32 %v288_v21, %v287_v6  ;;  %v292_v37 = vld [vmem:[#allocation2 + $0x868] sm:$0xff]  ;;  %v303_v43 = vld [vmem:[#allocation2 + $0x8c0] sm:$0xff]  ;;  %v293_v3 = vld [vmem:[#allocation2 + $0x870] sm:$0xff] }
  0x80   :  { %2088 = vst [vmem:[#allocation15_spill] sm:$0xff] %v1733_v27  ;;  %v896_v57 = vadd.f32 %v895_v29, %v894_v45  ;;  %v921_v13 = vrot.slane %v920_v53, 2  ;;  %v909_v46 = vadd.f32 %v908_v14, %v907_v10  ;;  %v977_v47 = vadd.f32 %v296_v18, %v295_v63  ;;  %v304_v45 = vld [vmem:[#allocation2 + $0x8c8] sm:$0xff]  ;;  %v311_v10 = vld [vmem:[#allocation2 + $0x900] sm:$0xff] }
  0x81   :  { %v934_v41 = vrot.slane %v933_v15, 2  ;;  %v946_v55 = vadd.f32 %v945_v38, %v944_v0  ;;  %v953_v11 = vadd.f32 %v952_v33, %v282_v8  ;;  %v965_v32 = vadd.f32 %v964_v34, %v289_v40  ;;  %v312_v58 = vld [vmem:[#allocation2 + $0x908] sm:$0xff]  ;;  %v305_v8 = vld [vmem:[#allocation2 + $0x8d0] sm:$0xff]  ;;  %v319_v40 = vld [vmem:[#allocation2 + $0x940] sm:$0xff] }
  0x82   :  { %v897_v60 = vrot.slane %v896_v57, 1  ;;  %v922_v31 = vadd.f32 %v921_v13, %v920_v53  ;;  %v910_v5 = vrot.slane %v909_v46, 1  ;;  %v978_v21 = vadd.f32 %v977_v47, %v297_v54  ;;  %v286_v53 = vld [vmem:[#allocation2 + $0x838] sm:$0xff]  ;;  %v320_v14 = vld [vmem:[#allocation2 + $0x948] sm:$0xff]  ;;  %v301_v34 = vld [vmem:[#allocation2 + $0x8b0] sm:$0xff] }
  0x83   :  { %v935_v44 = vadd.f32 %v934_v41, %v933_v15  ;;  %v947_v6 = vrot.slane %v946_v55, 2  ;;  %v954_v18 = vadd.f32 %v953_v11, %v283_v35  ;;  %v966_v29 = vadd.f32 %v965_v32, %v290_v51  ;;  %v313_v54 = vld [vmem:[#allocation2 + $0x910] sm:$0xff]  ;;  %v327_v41 = vld [vmem:[#allocation2 + $0x980] sm:$0xff]  ;;  %v328_v47 = vld [vmem:[#allocation2 + $0x988] sm:$0xff] }
  0x84   :  { %v1735_v0 = vadd.f32 %v897_v60, %v896_v57  ;;  %v923_v63 = vrot.slane %v922_v31, 1  ;;  %v1737_v38 = vadd.f32 %v910_v5, %v909_v46  ;;  %v979_v15 = vadd.f32 %v978_v21, %v298_v56  ;;  %v294_v51 = vld [vmem:[#allocation2 + $0x878] sm:$0xff]  ;;  %v335_v56 = vld [vmem:[#allocation2 + $0x9c0] sm:$0xff] }
  0x85   :  { %v936_v13 = vrot.slane %v935_v44, 1  ;;  %v948_v33 = vadd.f32 %v947_v6, %v946_v55  ;;  %v955_v57 = vadd.f32 %v954_v18, %v284_v50  ;;  %v967_v60 = vadd.f32 %v966_v29, %v291_v24  ;;  %v306_v11 = vld [vmem:[#allocation2 + $0x8d8] sm:$0xff]  ;;  %v329_v55 = vld [vmem:[#allocation2 + $0x990] sm:$0xff]  ;;  %v336_v6 = vld [vmem:[#allocation2 + $0x9c8] sm:$0xff] }
  0x86   :  { %2089 = vst [vmem:[#allocation16_spill] sm:$0xff] %v1735_v0  ;;  %2090 = vst [vmem:[#allocation17_spill] sm:$0xff] %v1737_v38  ;;  %v1739_v27 = vadd.f32 %v923_v63, %v922_v31  ;;  %v990_v35 = vadd.f32 %v304_v45, %v303_v43  ;;  %v314_v32 = vld [vmem:[#allocation2 + $0x918] sm:$0xff]  ;;  %v321_v0 = vld [vmem:[#allocation2 + $0x950] sm:$0xff]  ;;  %v980_v5 = vadd.f32 %v979_v15, %v299_v62 }
  0x87   :  { %v1741_v30 = vadd.f32 %v936_v13, %v935_v44  ;;  %v949_v46 = vrot.slane %v948_v33, 1  ;;  %v1003_v38 = vadd.f32 %v312_v58, %v311_v10  ;;  %v956_v21 = vadd.f32 %v955_v57, %v285_v25  ;;  %v302_v63 = vld [vmem:[#allocation2 + $0x8b8] sm:$0xff]  ;;  %v307_v50 = vld [vmem:[#allocation2 + $0x8e0] sm:$0xff]  ;;  %v316_v57 = vld [vmem:[#allocation2 + $0x928] sm:$0xff] }
  0x88   :  { %2091 = vst [vmem:[#allocation18_spill] sm:$0xff] %v1739_v27  ;;  %v968_v9 = vadd.f32 %v967_v60, %v292_v37  ;;  %v991_v17 = vadd.f32 %v990_v35, %v305_v8  ;;  %v1016_v31 = vadd.f32 %v320_v14, %v319_v40  ;;  %v322_v24 = vld [vmem:[#allocation2 + $0x958] sm:$0xff]  ;;  %v981_v45 = vadd.f32 %v980_v5, %v300_v23  ;;  %v315_v44 = vld [vmem:[#allocation2 + $0x920] sm:$0xff]  ;;  %v308_v27 = vld [vmem:[#allocation2 + $0x8e8] sm:$0xff] }
  0x89   :  { %2092 = vst [vmem:[#allocation19_spill] sm:$0xff] %v1741_v30  ;;  %v1743_v43 = vadd.f32 %v949_v46, %v948_v33  ;;  %v1004_v18 = vadd.f32 %v1003_v38, %v313_v54  ;;  %v1029_v29 = vadd.f32 %v328_v47, %v327_v41  ;;  %v330_v13 = vld [vmem:[#allocation2 + $0x998] sm:$0xff]  ;;  %v337_v30 = vld [vmem:[#allocation2 + $0x9d0] sm:$0xff]  ;;  %v957_v62 = vadd.f32 %v956_v21, %v286_v53  ;;  %v323_v25 = vld [vmem:[#allocation2 + $0x960] sm:$0xff] }
  0x8a   :  { %v969_v10 = vadd.f32 %v968_v9, %v293_v3  ;;  %v992_v58 = vadd.f32 %v991_v17, %v306_v11  ;;  %v1017_v15 = vadd.f32 %v1016_v31, %v321_v0  ;;  %v982_v37 = vadd.f32 %v981_v45, %v301_v34  ;;  %v331_v60 = vld [vmem:[#allocation2 + $0x9a0] sm:$0xff]  ;;  %v338_v33 = vld [vmem:[#allocation2 + $0x9d8] sm:$0xff]  ;;  %v309_v41 = vld [vmem:[#allocation2 + $0x8f0] sm:$0xff] }
  0x8b   :  { %2093 = vst [vmem:[#allocation20_spill] sm:$0xff] %v1743_v43  ;;  %v1005_v8 = vadd.f32 %v1004_v18, %v314_v32  ;;  %v1030_v40 = vadd.f32 %v1029_v29, %v329_v55  ;;  %v1042_v14 = vadd.f32 %v336_v6, %v335_v56  ;;  %v958_v35 = vrot.slane %v957_v62, 4  ;;  %v324_v47 = vld [vmem:[#allocation2 + $0x968] sm:$0xff]  ;;  %v317_v0 = vld [vmem:[#allocation2 + $0x930] sm:$0xff]  ;;  %v339_v11 = vld [vmem:[#allocation2 + $0x9e0] sm:$0xff] }
  0x8c   :  { %v970_v23 = vadd.f32 %v969_v10, %v294_v51  ;;  %v993_v38 = vadd.f32 %v992_v58, %v307_v50  ;;  %v1018_v54 = vadd.f32 %v1017_v15, %v322_v24  ;;  %v983_v46 = vadd.f32 %v982_v37, %v302_v63  ;;  %v332_v3 = vld [vmem:[#allocation2 + $0x9a8] sm:$0xff]  ;;  %v310_v56 = vld [vmem:[#allocation2 + $0x8f8] sm:$0xff]  ;;  %v325_v6 = vld [vmem:[#allocation2 + $0x970] sm:$0xff] }
  0x8d   :  { %v1006_v53 = vadd.f32 %v1005_v8, %v315_v44  ;;  %v1031_v9 = vadd.f32 %v1030_v40, %v330_v13  ;;  %v1043_v17 = vadd.f32 %v1042_v14, %v337_v30  ;;  %v959_v34 = vadd.f32 %v958_v35, %v957_v62  ;;  %v318_v24 = vld [vmem:[#allocation2 + $0x938] sm:$0xff]  ;;  %v333_v45 = vld [vmem:[#allocation2 + $0x9b0] sm:$0xff]  ;;  %v340_v18 = vld [vmem:[#allocation2 + $0x9e8] sm:$0xff] }
  0x8e   :  { %v971_v32 = vrot.slane %v970_v23, 4  ;;  %v994_v5 = vadd.f32 %v993_v38, %v308_v27  ;;  %v1019_v55 = vadd.f32 %v1018_v54, %v323_v25  ;;  %v984_v21 = vrot.slane %v983_v46, 4  ;;  %v326_v13 = vld [vmem:[#allocation2 + $0x978] sm:$0xff]  ;;  %v341_v25 = vld [vmem:[#allocation2 + $0x9f0] sm:$0xff] }
  0x8f   :  { %v1007_v31 = vadd.f32 %v1006_v53, %v316_v57  ;;  %v1032_v51 = vadd.f32 %v1031_v9, %v331_v60  ;;  %v1044_v50 = vadd.f32 %v1043_v17, %v338_v33  ;;  %v960_v63 = vrot.slane %v959_v34, 2  ;;  %v334_v27 = vld [vmem:[#allocation2 + $0x9b8] sm:$0xff]  ;;  %v343_v53 = vld [vmem:[#allocation2 + $0xa00] sm:$0xff] }
  0x90   :  { %v972_v29 = vadd.f32 %v971_v32, %v970_v23  ;;  %v995_v44 = vadd.f32 %v994_v5, %v309_v41  ;;  %v1020_v30 = vadd.f32 %v1019_v55, %v324_v47  ;;  %v985_v10 = vadd.f32 %v984_v21, %v983_v46  ;;  %v342_v38 = vld [vmem:[#allocation2 + $0x9f8] sm:$0xff]  ;;  %v344_v46 = vld [vmem:[#allocation2 + $0xa08] sm:$0xff]  ;;  %v345_v55 = vld [vmem:[#allocation2 + $0xa10] sm:$0xff] }
  0x91   :  { %v1008_v58 = vadd.f32 %v1007_v31, %v317_v0  ;;  %v1033_v62 = vadd.f32 %v1032_v51, %v332_v3  ;;  %v1045_v15 = vadd.f32 %v1044_v50, %v339_v11  ;;  %v961_v37 = vadd.f32 %v960_v63, %v959_v34 }
  0x92   :  { %v973_v8 = vrot.slane %v972_v29, 2  ;;  %v996_v40 = vadd.f32 %v995_v44, %v310_v56  ;;  %v1021_v14 = vadd.f32 %v1020_v30, %v325_v6  ;;  %v986_v57 = vrot.slane %v985_v10, 2  ;;  %v351_v56 = vld [vmem:[#allocation2 + $0xa40] sm:$0xff]  ;;  %v352_v6 = vld [vmem:[#allocation2 + $0xa48] sm:$0xff]  ;;  %v346_v30 = vld [vmem:[#allocation2 + $0xa18] sm:$0xff] }
  0x93   :  { %v1009_v60 = vadd.f32 %v1008_v58, %v318_v24  ;;  %v1034_v33 = vadd.f32 %v1033_v62, %v333_v45  ;;  %v1046_v35 = vadd.f32 %v1045_v15, %v340_v18  ;;  %v962_v54 = vrot.slane %v961_v37, 1  ;;  %v359_v24 = vld [vmem:[#allocation2 + $0xa80] sm:$0xff]  ;;  %v360_v45 = vld [vmem:[#allocation2 + $0xa88] sm:$0xff] }
  0x94   :  { %v974_v23 = vadd.f32 %v973_v8, %v972_v29  ;;  %v997_v41 = vrot.slane %v996_v40, 4  ;;  %v1022_v47 = vadd.f32 %v1021_v14, %v326_v13  ;;  %v987_v9 = vadd.f32 %v986_v57, %v985_v10  ;;  %v353_v13 = vld [vmem:[#allocation2 + $0xa50] sm:$0xff]  ;;  %v347_v14 = vld [vmem:[#allocation2 + $0xa20] sm:$0xff]  ;;  %v354_v57 = vld [vmem:[#allocation2 + $0xa58] sm:$0xff] }
  0x95   :  { %v1010_v17 = vrot.slane %v1009_v60, 4  ;;  %v1035_v0 = vadd.f32 %v1034_v33, %v334_v27  ;;  %v1047_v3 = vadd.f32 %v1046_v35, %v341_v25  ;;  %v1745_v11 = vadd.f32 %v962_v54, %v961_v37  ;;  %v361_v27 = vld [vmem:[#allocation2 + $0xa90] sm:$0xff]  ;;  %v348_v54 = vld [vmem:[#allocation2 + $0xa28] sm:$0xff] }
  0x96   :  { %v975_v34 = vrot.slane %v974_v23, 1  ;;  %v998_v32 = vadd.f32 %v997_v41, %v996_v40  ;;  %v1023_v5 = vrot.slane %v1022_v47, 4  ;;  %v988_v21 = vrot.slane %v987_v9, 1  ;;  %v362_v41 = vld [vmem:[#allocation2 + $0xa98] sm:$0xff] }
  0x97   :  { %2094 = vst [vmem:[#allocation21_spill] sm:$0xff] %v1745_v11  ;;  %v1011_v31 = vadd.f32 %v1010_v17, %v1009_v60  ;;  %v1036_v51 = vrot.slane %v1035_v0, 4  ;;  %v1048_v50 = vadd.f32 %v1047_v3, %v342_v38  ;;  %v1055_v44 = vadd.f32 %v344_v46, %v343_v53  ;;  %v349_v17 = vld [vmem:[#allocation2 + $0xa30] sm:$0xff]  ;;  %v363_v3 = vld [vmem:[#allocation2 + $0xaa0] sm:$0xff] }
  0x98   :  { %v1747_v18 = vadd.f32 %v975_v34, %v974_v23  ;;  %v999_v63 = vrot.slane %v998_v32, 2  ;;  %v1024_v29 = vadd.f32 %v1023_v5, %v1022_v47  ;;  %v1749_v10 = vadd.f32 %v988_v21, %v987_v9  ;;  %v355_v23 = vld [vmem:[#allocation2 + $0xa60] sm:$0xff]  ;;  %v364_v21 = vld [vmem:[#allocation2 + $0xaa8] sm:$0xff] }
  0x99   :  { %v1012_v58 = vrot.slane %v1011_v31, 2  ;;  %v1037_v62 = vadd.f32 %v1036_v51, %v1035_v0  ;;  %v1049_v15 = vrot.slane %v1048_v50, 4  ;;  %v1056_v8 = vadd.f32 %v1055_v44, %v345_v55  ;;  %v356_v0 = vld [vmem:[#allocation2 + $0xa68] sm:$0xff]  ;;  %v367_v34 = vld [vmem:[#allocation2 + $0xac0] sm:$0xff]  ;;  %v357_v44 = vld [vmem:[#allocation2 + $0xa70] sm:$0xff] }
  0x9a   :  { %2095 = vst [vmem:[#allocation22_spill] sm:$0xff] %v1747_v18  ;;  %2096 = vst [vmem:[#allocation23_spill] sm:$0xff] %v1749_v10  ;;  %v1000_v25 = vadd.f32 %v999_v63, %v998_v32  ;;  %v1025_v37 = vrot.slane %v1024_v29, 2  ;;  %v1068_v40 = vadd.f32 %v352_v6, %v351_v56  ;;  %v1081_v38 = vadd.f32 %v360_v45, %v359_v24  ;;  %v368_v32 = vld [vmem:[#allocation2 + $0xac8] sm:$0xff] }
  0x9b   :  { %v1013_v60 = vadd.f32 %v1012_v58, %v1011_v31  ;;  %v1038_v33 = vrot.slane %v1037_v62, 2  ;;  %v1050_v35 = vadd.f32 %v1049_v15, %v1048_v50  ;;  %v1057_v46 = vadd.f32 %v1056_v8, %v346_v30  ;;  %v375_v31 = vld [vmem:[#allocation2 + $0xb00] sm:$0xff]  ;;  %v376_v51 = vld [vmem:[#allocation2 + $0xb08] sm:$0xff]  ;;  %v369_v30 = vld [vmem:[#allocation2 + $0xad0] sm:$0xff] }
  0x9c   :  { %v1001_v47 = vrot.slane %v1000_v25, 1  ;;  %v1026_v53 = vadd.f32 %v1025_v37, %v1024_v29  ;;  %v1069_v9 = vadd.f32 %v1068_v40, %v353_v13  ;;  %v1082_v6 = vadd.f32 %v1081_v38, %v361_v27  ;;  %v350_v29 = vld [vmem:[#allocation2 + $0xa38] sm:$0xff]  ;;  %v383_v13 = vld [vmem:[#allocation2 + $0xb40] sm:$0xff]  ;;  %v384_v58 = vld [vmem:[#allocation2 + $0xb48] sm:$0xff] }
  0x9d   :  { %v1014_v5 = vrot.slane %v1013_v60, 1  ;;  %v1039_v55 = vadd.f32 %v1038_v33, %v1037_v62  ;;  %v1051_v56 = vrot.slane %v1050_v35, 2  ;;  %v1058_v45 = vadd.f32 %v1057_v46, %v347_v14  ;;  %v365_v40 = vld [vmem:[#allocation2 + $0xab0] sm:$0xff]  ;;  %v391_v33 = vld [vmem:[#allocation2 + $0xb80] sm:$0xff]  ;;  %v392_v38 = vld [vmem:[#allocation2 + $0xb88] sm:$0xff] }
  0x9e   :  { %v1751_v50 = vadd.f32 %v1001_v47, %v1000_v25  ;;  %v1027_v24 = vrot.slane %v1026_v53, 1  ;;  %v1070_v63 = vadd.f32 %v1069_v9, %v354_v57  ;;  %v1083_v62 = vadd.f32 %v1082_v6, %v362_v41  ;;  %v377_v27 = vld [vmem:[#allocation2 + $0xb10] sm:$0xff]  ;;  %v358_v57 = vld [vmem:[#allocation2 + $0xa78] sm:$0xff]  ;;  %v399_v41 = vld [vmem:[#allocation2 + $0xbc0] sm:$0xff] }
  0x9f   :  { %v1753_v15 = vadd.f32 %v1014_v5, %v1013_v60  ;;  %v1040_v37 = vrot.slane %v1039_v55, 1  ;;  %v1052_v8 = vadd.f32 %v1051_v56, %v1050_v35  ;;  %v1059_v25 = vadd.f32 %v1058_v45, %v348_v54  ;;  %v370_v46 = vld [vmem:[#allocation2 + $0xad8] sm:$0xff]  ;;  %v393_v35 = vld [vmem:[#allocation2 + $0xb90] sm:$0xff]  ;;  %v400_v56 = vld [vmem:[#allocation2 + $0xbc8] sm:$0xff] }
  0xa0   :  { %2097 = vst [vmem:[#allocation24_spill] sm:$0xff] %v1751_v50  ;;  %v1755_v10 = vadd.f32 %v1027_v24, %v1026_v53  ;;  %v1071_v47 = vadd.f32 %v1070_v63, %v355_v23  ;;  %v1094_v14 = vadd.f32 %v368_v32, %v367_v34  ;;  %v378_v9 = vld [vmem:[#allocation2 + $0xb18] sm:$0xff]  ;;  %v385_v50 = vld [vmem:[#allocation2 + $0xb50] sm:$0xff]  ;;  %v1084_v5 = vadd.f32 %v1083_v62, %v363_v3  ;;  %v371_v54 = vld [vmem:[#allocation2 + $0xae0] sm:$0xff] }
  0xa1   :  { %2098 = vst [vmem:[#allocation25_spill] sm:$0xff] %v1753_v15  ;;  %v1757_v18 = vadd.f32 %v1040_v37, %v1039_v55  ;;  %v1053_v60 = vrot.slane %v1052_v8, 1  ;;  %v1107_v15 = vadd.f32 %v376_v51, %v375_v31  ;;  %v1060_v6 = vadd.f32 %v1059_v25, %v349_v17  ;;  %v366_v24 = vld [vmem:[#allocation2 + $0xab8] sm:$0xff]  ;;  %v379_v55 = vld [vmem:[#allocation2 + $0xb20] sm:$0xff]  ;;  %v380_v25 = vld [vmem:[#allocation2 + $0xb28] sm:$0xff] }
  0xa2   :  { %2099 = vst [vmem:[#allocation26_spill] sm:$0xff] %v1755_v10  ;;  %v1072_v11 = vadd.f32 %v1071_v47, %v356_v0  ;;  %v1095_v43 = vadd.f32 %v1094_v14, %v369_v30  ;;  %v1120_v53 = vadd.f32 %v384_v58, %v383_v13  ;;  %v386_v23 = vld [vmem:[#allocation2 + $0xb58] sm:$0xff]  ;;  %v1085_v32 = vadd.f32 %v1084_v5, %v364_v21  ;;  %v372_v10 = vld [vmem:[#allocation2 + $0xae8] sm:$0xff]  ;;  %v387_v17 = vld [vmem:[#allocation2 + $0xb60] sm:$0xff] }
  0xa3   :  { %2100 = vst [vmem:[#allocation27_spill] sm:$0xff] %v1757_v18  ;;  %v1759_v34 = vadd.f32 %v1053_v60, %v1052_v8  ;;  %v1108_v45 = vadd.f32 %v1107_v15, %v377_v27  ;;  %v1133_v63 = vadd.f32 %v392_v38, %v391_v33  ;;  %v394_v37 = vld [vmem:[#allocation2 + $0xb98] sm:$0xff]  ;;  %v401_v18 = vld [vmem:[#allocation2 + $0xbd0] sm:$0xff]  ;;  %v1061_v3 = vadd.f32 %v1060_v6, %v350_v29  ;;  %v395_v47 = vld [vmem:[#allocation2 + $0xba0] sm:$0xff] }
  0xa4   :  { %v1073_v31 = vadd.f32 %v1072_v11, %v357_v44  ;;  %v1096_v51 = vadd.f32 %v1095_v43, %v370_v46  ;;  %v1121_v62 = vadd.f32 %v1120_v53, %v385_v50  ;;  %v1086_v0 = vadd.f32 %v1085_v32, %v365_v40  ;;  %v402_v8 = vld [vmem:[#allocation2 + $0xbd8] sm:$0xff]  ;;  %v373_v33 = vld [vmem:[#allocation2 + $0xaf0] sm:$0xff]  ;;  %v388_v38 = vld [vmem:[#allocation2 + $0xb68] sm:$0xff] }
  0xa5   :  { %2101 = vst [vmem:[#allocation28_spill] sm:$0xff] %v1759_v34  ;;  %v1109_v30 = vadd.f32 %v1108_v45, %v378_v9  ;;  %v1134_v13 = vadd.f32 %v1133_v63, %v393_v35  ;;  %v1146_v58 = vadd.f32 %v400_v56, %v399_v41  ;;  %v1062_v14 = vrot.slane %v1061_v3, 4  ;;  %v381_v50 = vld [vmem:[#allocation2 + $0xb30] sm:$0xff]  ;;  %v396_v44 = vld [vmem:[#allocation2 + $0xba8] sm:$0xff]  ;;  %v403_v46 = vld [vmem:[#allocation2 + $0xbe0] sm:$0xff] }
  0xa6   :  { %v1074_v21 = vadd.f32 %v1073_v31, %v358_v57  ;;  %v1097_v15 = vadd.f32 %v1096_v51, %v371_v54  ;;  %v1122_v27 = vadd.f32 %v1121_v62, %v386_v23  ;;  %v1087_v60 = vadd.f32 %v1086_v0, %v366_v24  ;;  %v374_v41 = vld [vmem:[#allocation2 + $0xaf8] sm:$0xff]  ;;  %v389_v56 = vld [vmem:[#allocation2 + $0xb70] sm:$0xff]  ;;  %v404_v45 = vld [vmem:[#allocation2 + $0xbe8] sm:$0xff] }
  0xa7   :  { %v1110_v29 = vadd.f32 %v1109_v30, %v379_v55  ;;  %v1135_v11 = vadd.f32 %v1134_v13, %v394_v37  ;;  %v1147_v43 = vadd.f32 %v1146_v58, %v401_v18  ;;  %v1063_v40 = vadd.f32 %v1062_v14, %v1061_v3  ;;  %v382_v23 = vld [vmem:[#allocation2 + $0xb38] sm:$0xff]  ;;  %v397_v32 = vld [vmem:[#allocation2 + $0xbb0] sm:$0xff] }
  0xa8   :  { %v1075_v9 = vrot.slane %v1074_v21, 4  ;;  %v1098_v5 = vadd.f32 %v1097_v15, %v372_v10  ;;  %v1123_v35 = vadd.f32 %v1122_v27, %v387_v17  ;;  %v1088_v6 = vrot.slane %v1087_v60, 4  ;;  %v390_v37 = vld [vmem:[#allocation2 + $0xb78] sm:$0xff]  ;;  %v405_v17 = vld [vmem:[#allocation2 + $0xbf0] sm:$0xff] }
  0xa9   :  { %v1111_v53 = vadd.f32 %v1110_v29, %v380_v25  ;;  %v1136_v57 = vadd.f32 %v1135_v11, %v395_v47  ;;  %v1148_v54 = vadd.f32 %v1147_v43, %v402_v8  ;;  %v1064_v24 = vrot.slane %v1063_v40, 2  ;;  %v398_v10 = vld [vmem:[#allocation2 + $0xbb8] sm:$0xff]  ;;  %v407_v29 = vld [vmem:[#allocation2 + $0xc00] sm:$0xff] }
  0xaa   :  { %v1076_v63 = vadd.f32 %v1075_v9, %v1074_v21  ;;  %v1099_v55 = vadd.f32 %v1098_v5, %v373_v33  ;;  %v1124_v18 = vadd.f32 %v1123_v35, %v388_v38  ;;  %v1089_v31 = vadd.f32 %v1088_v6, %v1087_v60  ;;  %v406_v15 = vld [vmem:[#allocation2 + $0xbf8] sm:$0xff]  ;;  %v408_v60 = vld [vmem:[#allocation2 + $0xc08] sm:$0xff]  ;;  %v409_v35 = vld [vmem:[#allocation2 + $0xc10] sm:$0xff] }
  0xab   :  { %v1112_v51 = vadd.f32 %v1111_v53, %v381_v50  ;;  %v1137_v3 = vadd.f32 %v1136_v57, %v396_v44  ;;  %v1149_v62 = vadd.f32 %v1148_v54, %v403_v46  ;;  %v1065_v0 = vadd.f32 %v1064_v24, %v1063_v40 }
  0xac   :  { %v1077_v30 = vrot.slane %v1076_v63, 2  ;;  %v1100_v13 = vadd.f32 %v1099_v55, %v374_v41  ;;  %v1125_v58 = vadd.f32 %v1124_v18, %v389_v56  ;;  %v1090_v25 = vrot.slane %v1089_v31, 2  ;;  %v415_v41 = vld [vmem:[#allocation2 + $0xc40] sm:$0xff]  ;;  %v416_v56 = vld [vmem:[#allocation2 + $0xc48] sm:$0xff]  ;;  %v410_v18 = vld [vmem:[#allocation2 + $0xc18] sm:$0xff] }
  0xad   :  { %v1113_v47 = vadd.f32 %v1112_v51, %v382_v23  ;;  %v1138_v8 = vadd.f32 %v1137_v3, %v397_v32  ;;  %v1150_v14 = vadd.f32 %v1149_v62, %v404_v45  ;;  %v1066_v27 = vrot.slane %v1065_v0, 1  ;;  %v423_v23 = vld [vmem:[#allocation2 + $0xc80] sm:$0xff]  ;;  %v424_v32 = vld [vmem:[#allocation2 + $0xc88] sm:$0xff] }
  0xae   :  { %v1078_v21 = vadd.f32 %v1077_v30, %v1076_v63  ;;  %v1101_v33 = vrot.slane %v1100_v13, 4  ;;  %v1126_v38 = vadd.f32 %v1125_v58, %v390_v37  ;;  %v1091_v11 = vadd.f32 %v1090_v25, %v1089_v31  ;;  %v417_v37 = vld [vmem:[#allocation2 + $0xc50] sm:$0xff]  ;;  %v411_v58 = vld [vmem:[#allocation2 + $0xc20] sm:$0xff]  ;;  %v418_v25 = vld [vmem:[#allocation2 + $0xc58] sm:$0xff] }
  0xaf   :  { %v1114_v43 = vrot.slane %v1113_v47, 4  ;;  %v1139_v50 = vadd.f32 %v1138_v8, %v398_v10  ;;  %v1151_v44 = vadd.f32 %v1150_v14, %v405_v17  ;;  %v1761_v46 = vadd.f32 %v1066_v27, %v1065_v0  ;;  %v425_v10 = vld [vmem:[#allocation2 + $0xc90] sm:$0xff]  ;;  %v412_v27 = vld [vmem:[#allocation2 + $0xc28] sm:$0xff] }
  0xb0   :  { %v1079_v40 = vrot.slane %v1078_v21, 1  ;;  %v1102_v9 = vadd.f32 %v1101_v33, %v1100_v13  ;;  %v1127_v5 = vrot.slane %v1126_v38, 4  ;;  %v1092_v6 = vrot.slane %v1091_v11, 1  ;;  %v426_v33 = vld [vmem:[#allocation2 + $0xc98] sm:$0xff] }
  0xb1   :  { %2102 = vst [vmem:[#allocation29_spill] sm:$0xff] %v1761_v46  ;;  %v1115_v53 = vadd.f32 %v1114_v43, %v1113_v47  ;;  %v1140_v57 = vrot.slane %v1139_v50, 4  ;;  %v1152_v54 = vadd.f32 %v1151_v44, %v406_v15  ;;  %v1159_v55 = vadd.f32 %v408_v60, %v407_v29  ;;  %v413_v43 = vld [vmem:[#allocation2 + $0xc30] sm:$0xff]  ;;  %v427_v44 = vld [vmem:[#allocation2 + $0xca0] sm:$0xff] }
  0xb2   :  { %v1763_v45 = vadd.f32 %v1079_v40, %v1078_v21  ;;  %v1103_v24 = vrot.slane %v1102_v9, 2  ;;  %v1128_v63 = vadd.f32 %v1127_v5, %v1126_v38  ;;  %v1765_v31 = vadd.f32 %v1092_v6, %v1091_v11  ;;  %v419_v21 = vld [vmem:[#allocation2 + $0xc60] sm:$0xff]  ;;  %v428_v6 = vld [vmem:[#allocation2 + $0xca8] sm:$0xff] }
  0xb3   :  { %v1116_v51 = vrot.slane %v1115_v53, 2  ;;  %v1141_v3 = vadd.f32 %v1140_v57, %v1139_v50  ;;  %v1153_v62 = vrot.slane %v1152_v54, 4  ;;  %v1160_v30 = vadd.f32 %v1159_v55, %v409_v35  ;;  %v420_v50 = vld [vmem:[#allocation2 + $0xc68] sm:$0xff]  ;;  %v431_v40 = vld [vmem:[#allocation2 + $0xcc0] sm:$0xff]  ;;  %v421_v55 = vld [vmem:[#allocation2 + $0xc70] sm:$0xff] }
  0xb4   :  { %2103 = vst [vmem:[#allocation30_spill] sm:$0xff] %v1763_v45  ;;  %2104 = vst [vmem:[#allocation31_spill] sm:$0xff] %v1765_v31  ;;  %v1104_v17 = vadd.f32 %v1103_v24, %v1102_v9  ;;  %v1129_v0 = vrot.slane %v1128_v63, 2  ;;  %v1172_v13 = vadd.f32 %v416_v56, %v415_v41  ;;  %v1185_v15 = vadd.f32 %v424_v32, %v423_v23  ;;  %v432_v9 = vld [vmem:[#allocation2 + $0xcc8] sm:$0xff] }
  0xb5   :  { %v1117_v47 = vadd.f32 %v1116_v51, %v1115_v53  ;;  %v1142_v8 = vrot.slane %v1141_v3, 2  ;;  %v1154_v14 = vadd.f32 %v1153_v62, %v1152_v54  ;;  %v1161_v60 = vadd.f32 %v1160_v30, %v410_v18  ;;  %v439_v53 = vld [vmem:[#allocation2 + $0xd00] sm:$0xff]  ;;  %v440_v57 = vld [vmem:[#allocation2 + $0xd08] sm:$0xff]  ;;  %v433_v18 = vld [vmem:[#allocation2 + $0xcd0] sm:$0xff] }
  0xb6   :  { %v1105_v38 = vrot.slane %v1104_v17, 1  ;;  %v1130_v29 = vadd.f32 %v1129_v0, %v1128_v63  ;;  %v1173_v11 = vadd.f32 %v1172_v13, %v417_v37  ;;  %v1186_v56 = vadd.f32 %v1185_v15, %v425_v10  ;;  %v414_v63 = vld [vmem:[#allocation2 + $0xc38] sm:$0xff]  ;;  %v447_v37 = vld [vmem:[#allocation2 + $0xd40] sm:$0xff]  ;;  %v448_v51 = vld [vmem:[#allocation2 + $0xd48] sm:$0xff] }
  0xb7   :  { %v1118_v5 = vrot.slane %v1117_v47, 1  ;;  %v1143_v35 = vadd.f32 %v1142_v8, %v1141_v3  ;;  %v1155_v41 = vrot.slane %v1154_v14, 2  ;;  %v1162_v32 = vadd.f32 %v1161_v60, %v411_v58  ;;  %v429_v13 = vld [vmem:[#allocation2 + $0xcb0] sm:$0xff]  ;;  %v455_v8 = vld [vmem:[#allocation2 + $0xd80] sm:$0xff]  ;;  %v456_v15 = vld [vmem:[#allocation2 + $0xd88] sm:$0xff] }
  0xb8   :  { %v1767_v54 = vadd.f32 %v1105_v38, %v1104_v17  ;;  %v1131_v23 = vrot.slane %v1130_v29, 1  ;;  %v1174_v24 = vadd.f32 %v1173_v11, %v418_v25  ;;  %v1187_v3 = vadd.f32 %v1186_v56, %v426_v33  ;;  %v441_v10 = vld [vmem:[#allocation2 + $0xd10] sm:$0xff]  ;;  %v422_v25 = vld [vmem:[#allocation2 + $0xc78] sm:$0xff]  ;;  %v463_v33 = vld [vmem:[#allocation2 + $0xdc0] sm:$0xff] }
  0xb9   :  { %v1769_v62 = vadd.f32 %v1118_v5, %v1117_v47  ;;  %v1144_v0 = vrot.slane %v1143_v35, 1  ;;  %v1156_v30 = vadd.f32 %v1155_v41, %v1154_v14  ;;  %v1163_v17 = vadd.f32 %v1162_v32, %v412_v27  ;;  %v434_v60 = vld [vmem:[#allocation2 + $0xcd8] sm:$0xff]  ;;  %v457_v14 = vld [vmem:[#allocation2 + $0xd90] sm:$0xff]  ;;  %v464_v41 = vld [vmem:[#allocation2 + $0xdc8] sm:$0xff] }
  0xba   :  { %2105 = vst [vmem:[#allocation32_spill] sm:$0xff] %v1767_v54  ;;  %v1771_v31 = vadd.f32 %v1131_v23, %v1130_v29  ;;  %v1175_v38 = vadd.f32 %v1174_v24, %v419_v21  ;;  %v1198_v58 = vadd.f32 %v432_v9, %v431_v40  ;;  %v442_v11 = vld [vmem:[#allocation2 + $0xd18] sm:$0xff]  ;;  %v449_v54 = vld [vmem:[#allocation2 + $0xd50] sm:$0xff]  ;;  %v1188_v5 = vadd.f32 %v1187_v3, %v427_v44  ;;  %v435_v27 = vld [vmem:[#allocation2 + $0xce0] sm:$0xff] }
  0xbb   :  { %2106 = vst [vmem:[#allocation33_spill] sm:$0xff] %v1769_v62  ;;  %v1773_v45 = vadd.f32 %v1144_v0, %v1143_v35  ;;  %v1157_v47 = vrot.slane %v1156_v30, 1  ;;  %v1211_v62 = vadd.f32 %v440_v57, %v439_v53  ;;  %v1164_v56 = vadd.f32 %v1163_v17, %v413_v43  ;;  %v430_v23 = vld [vmem:[#allocation2 + $0xcb8] sm:$0xff]  ;;  %v443_v35 = vld [vmem:[#allocation2 + $0xd20] sm:$0xff]  ;;  %v444_v17 = vld [vmem:[#allocation2 + $0xd28] sm:$0xff] }
  0xbc   :  { %2107 = vst [vmem:[#allocation34_spill] sm:$0xff] %v1771_v31  ;;  %v1176_v46 = vadd.f32 %v1175_v38, %v420_v50  ;;  %v1199_v34 = vadd.f32 %v1198_v58, %v433_v18  ;;  %v1224_v29 = vadd.f32 %v448_v51, %v447_v37  ;;  %v450_v21 = vld [vmem:[#allocation2 + $0xd58] sm:$0xff]  ;;  %v1189_v9 = vadd.f32 %v1188_v5, %v428_v6  ;;  %v436_v31 = vld [vmem:[#allocation2 + $0xce8] sm:$0xff]  ;;  %v451_v43 = vld [vmem:[#allocation2 + $0xd60] sm:$0xff] }
  0xbd   :  { %2108 = vst [vmem:[#allocation35_spill] sm:$0xff] %v1773_v45  ;;  %v1775_v40 = vadd.f32 %v1157_v47, %v1156_v30  ;;  %v1212_v32 = vadd.f32 %v1211_v62, %v441_v10  ;;  %v1237_v24 = vadd.f32 %v456_v15, %v455_v8  ;;  %v458_v0 = vld [vmem:[#allocation2 + $0xd98] sm:$0xff]  ;;  %v465_v45 = vld [vmem:[#allocation2 + $0xdd0] sm:$0xff]  ;;  %v1165_v44 = vadd.f32 %v1164_v56, %v414_v63  ;;  %v459_v38 = vld [vmem:[#allocation2 + $0xda0] sm:$0xff] }
  0xbe   :  { %v1177_v53 = vadd.f32 %v1176_v46, %v421_v55  ;;  %v1200_v57 = vadd.f32 %v1199_v34, %v434_v60  ;;  %v1225_v3 = vadd.f32 %v1224_v29, %v449_v54  ;;  %v1190_v50 = vadd.f32 %v1189_v9, %v429_v13  ;;  %v466_v30 = vld [vmem:[#allocation2 + $0xdd8] sm:$0xff]  ;;  %v437_v8 = vld [vmem:[#allocation2 + $0xcf0] sm:$0xff]  ;;  %v452_v15 = vld [vmem:[#allocation2 + $0xd68] sm:$0xff] }
  0xbf   :  { %2109 = vst [vmem:[#allocation36_spill] sm:$0xff] %v1775_v40  ;;  %v1213_v18 = vadd.f32 %v1212_v32, %v442_v11  ;;  %v1238_v37 = vadd.f32 %v1237_v24, %v457_v14  ;;  %v1250_v51 = vadd.f32 %v464_v41, %v463_v33  ;;  %v1166_v58 = vrot.slane %v1165_v44, 4  ;;  %v445_v54 = vld [vmem:[#allocation2 + $0xd30] sm:$0xff]  ;;  %v460_v55 = vld [vmem:[#allocation2 + $0xda8] sm:$0xff]  ;;  %v467_v60 = vld [vmem:[#allocation2 + $0xde0] sm:$0xff] }
  0xc0   :  { %v1178_v6 = vadd.f32 %v1177_v53, %v422_v25  ;;  %v1201_v62 = vadd.f32 %v1200_v57, %v435_v27  ;;  %v1226_v10 = vadd.f32 %v1225_v3, %v450_v21  ;;  %v1191_v47 = vadd.f32 %v1190_v50, %v430_v23  ;;  %v438_v33 = vld [vmem:[#allocation2 + $0xcf8] sm:$0xff]  ;;  %v453_v41 = vld [vmem:[#allocation2 + $0xd70] sm:$0xff]  ;;  %v468_v32 = vld [vmem:[#allocation2 + $0xde8] sm:$0xff] }
  0xc1   :  { %v1214_v63 = vadd.f32 %v1213_v18, %v443_v35  ;;  %v1239_v46 = vadd.f32 %v1238_v37, %v458_v0  ;;  %v1251_v34 = vadd.f32 %v1250_v51, %v465_v45  ;;  %v1167_v13 = vadd.f32 %v1166_v58, %v1165_v44  ;;  %v446_v21 = vld [vmem:[#allocation2 + $0xd38] sm:$0xff]  ;;  %v461_v9 = vld [vmem:[#allocation2 + $0xdb0] sm:$0xff] }
  0xc2   :  { %v1179_v11 = vrot.slane %v1178_v6, 4  ;;  %v1202_v5 = vadd.f32 %v1201_v62, %v436_v31  ;;  %v1227_v14 = vadd.f32 %v1226_v10, %v451_v43  ;;  %v1192_v56 = vrot.slane %v1191_v47, 4  ;;  %v454_v0 = vld [vmem:[#allocation2 + $0xd78] sm:$0xff]  ;;  %v469_v43 = vld [vmem:[#allocation2 + $0xdf0] sm:$0xff] }
  0xc3   :  { %v1215_v29 = vadd.f32 %v1214_v63, %v444_v17  ;;  %v1240_v25 = vadd.f32 %v1239_v46, %v459_v38  ;;  %v1252_v27 = vadd.f32 %v1251_v34, %v466_v30  ;;  %v1168_v23 = vrot.slane %v1167_v13, 2  ;;  %v462_v31 = vld [vmem:[#allocation2 + $0xdb8] sm:$0xff]  ;;  %v471_v63 = vld [vmem:[#allocation2 + $0xe00] sm:$0xff] }
  0xc4   :  { %v1180_v24 = vadd.f32 %v1179_v11, %v1178_v6  ;;  %v1203_v35 = vadd.f32 %v1202_v5, %v437_v8  ;;  %v1228_v45 = vadd.f32 %v1227_v14, %v452_v15  ;;  %v1193_v53 = vadd.f32 %v1192_v56, %v1191_v47  ;;  %v470_v62 = vld [vmem:[#allocation2 + $0xdf8] sm:$0xff]  ;;  %v472_v47 = vld [vmem:[#allocation2 + $0xe08] sm:$0xff]  ;;  %v473_v14 = vld [vmem:[#allocation2 + $0xe10] sm:$0xff] }
  0xc5   :  { %v1216_v57 = vadd.f32 %v1215_v29, %v445_v54  ;;  %v1241_v44 = vadd.f32 %v1240_v25, %v460_v55  ;;  %v1253_v3 = vadd.f32 %v1252_v27, %v467_v60  ;;  %v1169_v50 = vadd.f32 %v1168_v23, %v1167_v13 }
  0xc6   :  { %v1181_v18 = vrot.slane %v1180_v24, 2  ;;  %v1204_v37 = vadd.f32 %v1203_v35, %v438_v33  ;;  %v1229_v51 = vadd.f32 %v1228_v45, %v453_v41  ;;  %v1194_v17 = vrot.slane %v1193_v53, 2  ;;  %v479_v33 = vld [vmem:[#allocation2 + $0xe40] sm:$0xff]  ;;  %v480_v41 = vld [vmem:[#allocation2 + $0xe48] sm:$0xff]  ;;  %v474_v45 = vld [vmem:[#allocation2 + $0xe18] sm:$0xff] }
  0xc7   :  { %v1217_v38 = vadd.f32 %v1216_v57, %v446_v21  ;;  %v1242_v30 = vadd.f32 %v1241_v44, %v461_v9  ;;  %v1254_v58 = vadd.f32 %v1253_v3, %v468_v32  ;;  %v1170_v10 = vrot.slane %v1169_v50, 1  ;;  %v487_v21 = vld [vmem:[#allocation2 + $0xe80] sm:$0xff]  ;;  %v488_v9 = vld [vmem:[#allocation2 + $0xe88] sm:$0xff] }
  0xc8   :  { %v1182_v6 = vadd.f32 %v1181_v18, %v1180_v24  ;;  %v1205_v8 = vrot.slane %v1204_v37, 4  ;;  %v1230_v15 = vadd.f32 %v1229_v51, %v454_v0  ;;  %v1195_v46 = vadd.f32 %v1194_v17, %v1193_v53  ;;  %v481_v0 = vld [vmem:[#allocation2 + $0xe50] sm:$0xff]  ;;  %v475_v51 = vld [vmem:[#allocation2 + $0xe20] sm:$0xff]  ;;  %v482_v17 = vld [vmem:[#allocation2 + $0xe58] sm:$0xff] }
  0xc9   :  { %v1218_v34 = vrot.slane %v1217_v38, 4  ;;  %v1243_v54 = vadd.f32 %v1242_v30, %v462_v31  ;;  %v1255_v55 = vadd.f32 %v1254_v58, %v469_v43  ;;  %v1777_v60 = vadd.f32 %v1170_v10, %v1169_v50  ;;  %v489_v31 = vld [vmem:[#allocation2 + $0xe90] sm:$0xff]  ;;  %v476_v10 = vld [vmem:[#allocation2 + $0xe28] sm:$0xff] }
  0xca   :  { %v1183_v13 = vrot.slane %v1182_v6, 1  ;;  %v1206_v11 = vadd.f32 %v1205_v8, %v1204_v37  ;;  %v1231_v5 = vrot.slane %v1230_v15, 4  ;;  %v1196_v56 = vrot.slane %v1195_v46, 1  ;;  %v490_v8 = vld [vmem:[#allocation2 + $0xe98] sm:$0xff] }
  0xcb   :  { %2110 = vst [vmem:[#allocation37_spill] sm:$0xff] %v1777_v60  ;;  %v1219_v29 = vadd.f32 %v1218_v34, %v1217_v38  ;;  %v1244_v25 = vrot.slane %v1243_v54, 4  ;;  %v1256_v27 = vadd.f32 %v1255_v55, %v470_v62  ;;  %v1263_v35 = vadd.f32 %v472_v47, %v471_v63  ;;  %v477_v34 = vld [vmem:[#allocation2 + $0xe30] sm:$0xff]  ;;  %v491_v55 = vld [vmem:[#allocation2 + $0xea0] sm:$0xff] }
  0xcc   :  { %v1779_v32 = vadd.f32 %v1183_v13, %v1182_v6  ;;  %v1207_v23 = vrot.slane %v1206_v11, 2  ;;  %v1232_v24 = vadd.f32 %v1231_v5, %v1230_v15  ;;  %v1781_v53 = vadd.f32 %v1196_v56, %v1195_v46  ;;  %v483_v6 = vld [vmem:[#allocation2 + $0xe60] sm:$0xff]  ;;  %v492_v56 = vld [vmem:[#allocation2 + $0xea8] sm:$0xff] }
  0xcd   :  { %v1220_v57 = vrot.slane %v1219_v29, 2  ;;  %v1245_v44 = vadd.f32 %v1244_v25, %v1243_v54  ;;  %v1257_v3 = vrot.slane %v1256_v27, 4  ;;  %v1264_v18 = vadd.f32 %v1263_v35, %v473_v14  ;;  %v484_v54 = vld [vmem:[#allocation2 + $0xe68] sm:$0xff]  ;;  %v495_v13 = vld [vmem:[#allocation2 + $0xec0] sm:$0xff]  ;;  %v485_v35 = vld [vmem:[#allocation2 + $0xe70] sm:$0xff] }
  0xce   :  { %2111 = vst [vmem:[#allocation38_spill] sm:$0xff] %v1779_v32  ;;  %2112 = vst [vmem:[#allocation39_spill] sm:$0xff] %v1781_v53  ;;  %v1208_v43 = vadd.f32 %v1207_v23, %v1206_v11  ;;  %v1233_v50 = vrot.slane %v1232_v24, 2  ;;  %v1276_v37 = vadd.f32 %v480_v41, %v479_v33  ;;  %v1289_v62 = vadd.f32 %v488_v9, %v487_v21  ;;  %v496_v11 = vld [vmem:[#allocation2 + $0xec8] sm:$0xff] }
  0xcf   :  { %v1221_v38 = vadd.f32 %v1220_v57, %v1219_v29  ;;  %v1246_v30 = vrot.slane %v1245_v44, 2  ;;  %v1258_v58 = vadd.f32 %v1257_v3, %v1256_v27  ;;  %v1265_v47 = vadd.f32 %v1264_v18, %v474_v45  ;;  %v503_v29 = vld [vmem:[#allocation2 + $0xf00] sm:$0xff]  ;;  %v504_v25 = vld [vmem:[#allocation2 + $0xf08] sm:$0xff]  ;;  %v497_v45 = vld [vmem:[#allocation2 + $0xed0] sm:$0xff] }
  0xd0   :  { %v1209_v15 = vrot.slane %v1208_v43, 1  ;;  %v1234_v63 = vadd.f32 %v1233_v50, %v1232_v24  ;;  %v1277_v46 = vadd.f32 %v1276_v37, %v481_v0  ;;  %v1290_v41 = vadd.f32 %v1289_v62, %v489_v31  ;;  %v478_v24 = vld [vmem:[#allocation2 + $0xe38] sm:$0xff]  ;;  %v511_v0 = vld [vmem:[#allocation2 + $0xf40] sm:$0xff]  ;;  %v512_v57 = vld [vmem:[#allocation2 + $0xf48] sm:$0xff] }
  0xd1   :  { %v1222_v5 = vrot.slane %v1221_v38, 1  ;;  %v1247_v14 = vadd.f32 %v1246_v30, %v1245_v44  ;;  %v1259_v33 = vrot.slane %v1258_v58, 2  ;;  %v1266_v9 = vadd.f32 %v1265_v47, %v475_v51  ;;  %v493_v37 = vld [vmem:[#allocation2 + $0xeb0] sm:$0xff]  ;;  %v519_v30 = vld [vmem:[#allocation2 + $0xf80] sm:$0xff]  ;;  %v520_v62 = vld [vmem:[#allocation2 + $0xf88] sm:$0xff] }
  0xd2   :  { %v1783_v27 = vadd.f32 %v1209_v15, %v1208_v43  ;;  %v1235_v21 = vrot.slane %v1234_v63, 1  ;;  %v1278_v23 = vadd.f32 %v1277_v46, %v482_v17  ;;  %v1291_v44 = vadd.f32 %v1290_v41, %v490_v8  ;;  %v505_v31 = vld [vmem:[#allocation2 + $0xf10] sm:$0xff]  ;;  %v486_v17 = vld [vmem:[#allocation2 + $0xe78] sm:$0xff]  ;;  %v527_v8 = vld [vmem:[#allocation2 + $0xfc0] sm:$0xff] }
  0xd3   :  { %v1785_v3 = vadd.f32 %v1222_v5, %v1221_v38  ;;  %v1248_v50 = vrot.slane %v1247_v14, 1  ;;  %v1260_v18 = vadd.f32 %v1259_v33, %v1258_v58  ;;  %v1267_v43 = vadd.f32 %v1266_v9, %v476_v10  ;;  %v498_v47 = vld [vmem:[#allocation2 + $0xed8] sm:$0xff]  ;;  %v521_v58 = vld [vmem:[#allocation2 + $0xf90] sm:$0xff]  ;;  %v528_v33 = vld [vmem:[#allocation2 + $0xfc8] sm:$0xff] }
  0xd4   :  { %2113 = vst [vmem:[#allocation40_spill] sm:$0xff] %v1783_v27  ;;  %v1787_v53 = vadd.f32 %v1235_v21, %v1234_v63  ;;  %v1279_v15 = vadd.f32 %v1278_v23, %v483_v6  ;;  %v1302_v51 = vadd.f32 %v496_v11, %v495_v13  ;;  %v506_v46 = vld [vmem:[#allocation2 + $0xf18] sm:$0xff]  ;;  %v513_v27 = vld [vmem:[#allocation2 + $0xf50] sm:$0xff]  ;;  %v1292_v5 = vadd.f32 %v1291_v44, %v491_v55  ;;  %v499_v10 = vld [vmem:[#allocation2 + $0xee0] sm:$0xff] }
  0xd5   :  { %2114 = vst [vmem:[#allocation41_spill] sm:$0xff] %v1785_v3  ;;  %v1789_v32 = vadd.f32 %v1248_v50, %v1247_v14  ;;  %v1261_v38 = vrot.slane %v1260_v18, 1  ;;  %v1315_v3 = vadd.f32 %v504_v25, %v503_v29  ;;  %v1268_v41 = vadd.f32 %v1267_v43, %v477_v34  ;;  %v494_v21 = vld [vmem:[#allocation2 + $0xeb8] sm:$0xff]  ;;  %v507_v14 = vld [vmem:[#allocation2 + $0xf20] sm:$0xff]  ;;  %v508_v43 = vld [vmem:[#allocation2 + $0xf28] sm:$0xff] }
  0xd6   :  { %2115 = vst [vmem:[#allocation42_spill] sm:$0xff] %v1787_v53  ;;  %v1280_v60 = vadd.f32 %v1279_v15, %v484_v54  ;;  %v1303_v40 = vadd.f32 %v1302_v51, %v497_v45  ;;  %v1328_v63 = vadd.f32 %v512_v57, %v511_v0  ;;  %v514_v6 = vld [vmem:[#allocation2 + $0xf58] sm:$0xff]  ;;  %v1293_v11 = vadd.f32 %v1292_v5, %v492_v56  ;;  %v500_v53 = vld [vmem:[#allocation2 + $0xee8] sm:$0xff]  ;;  %v515_v34 = vld [vmem:[#allocation2 + $0xf60] sm:$0xff] }
  0xd7   :  { %2116 = vst [vmem:[#allocation43_spill] sm:$0xff] %v1789_v32  ;;  %v1791_v13 = vadd.f32 %v1261_v38, %v1260_v18  ;;  %v1316_v9 = vadd.f32 %v1315_v3, %v505_v31  ;;  %v1341_v23 = vadd.f32 %v520_v62, %v519_v30  ;;  %v522_v50 = vld [vmem:[#allocation2 + $0xf98] sm:$0xff]  ;;  %v529_v32 = vld [vmem:[#allocation2 + $0xfd0] sm:$0xff]  ;;  %v1269_v55 = vadd.f32 %v1268_v41, %v478_v24  ;;  %v523_v15 = vld [vmem:[#allocation2 + $0xfa0] sm:$0xff] }
  0xd8   :  { %v1281_v29 = vadd.f32 %v1280_v60, %v485_v35  ;;  %v1304_v25 = vadd.f32 %v1303_v40, %v498_v47  ;;  %v1329_v44 = vadd.f32 %v1328_v63, %v513_v27  ;;  %v1294_v54 = vadd.f32 %v1293_v11, %v493_v37  ;;  %v530_v18 = vld [vmem:[#allocation2 + $0xfd8] sm:$0xff]  ;;  %v501_v30 = vld [vmem:[#allocation2 + $0xef0] sm:$0xff]  ;;  %v516_v62 = vld [vmem:[#allocation2 + $0xf68] sm:$0xff] }
  0xd9   :  { %v1317_v45 = vadd.f32 %v1316_v9, %v506_v46  ;;  %v1342_v0 = vadd.f32 %v1341_v23, %v521_v58  ;;  %v1354_v57 = vadd.f32 %v528_v33, %v527_v8  ;;  %v1270_v51 = vrot.slane %v1269_v55, 4  ;;  %v509_v27 = vld [vmem:[#allocation2 + $0xf30] sm:$0xff]  ;;  %v524_v35 = vld [vmem:[#allocation2 + $0xfa8] sm:$0xff]  ;;  %v531_v47 = vld [vmem:[#allocation2 + $0xfe0] sm:$0xff] }
  0xda   :  { %v1282_v56 = vadd.f32 %v1281_v29, %v486_v17  ;;  %v1305_v3 = vadd.f32 %v1304_v25, %v499_v10  ;;  %v1330_v31 = vadd.f32 %v1329_v44, %v514_v6  ;;  %v1295_v38 = vadd.f32 %v1294_v54, %v494_v21  ;;  %v502_v8 = vld [vmem:[#allocation2 + $0xef8] sm:$0xff]  ;;  %v517_v33 = vld [vmem:[#allocation2 + $0xf70] sm:$0xff]  ;;  %v532_v9 = vld [vmem:[#allocation2 + $0xfe8] sm:$0xff] }
  0xdb   :  { %v1318_v24 = vadd.f32 %v1317_v45, %v507_v14  ;;  %v1343_v60 = vadd.f32 %v1342_v0, %v522_v50  ;;  %v1355_v40 = vadd.f32 %v1354_v57, %v529_v32  ;;  %v1271_v37 = vadd.f32 %v1270_v51, %v1269_v55  ;;  %v510_v6 = vld [vmem:[#allocation2 + $0xf38] sm:$0xff]  ;;  %v525_v11 = vld [vmem:[#allocation2 + $0xfb0] sm:$0xff] }
  0xdc   :  { %v1283_v46 = vrot.slane %v1282_v56, 4  ;;  %v1306_v5 = vadd.f32 %v1305_v3, %v500_v53  ;;  %v1331_v58 = vadd.f32 %v1330_v31, %v515_v34  ;;  %v1296_v41 = vrot.slane %v1295_v38, 4  ;;  %v518_v50 = vld [vmem:[#allocation2 + $0xf78] sm:$0xff]  ;;  %v533_v34 = vld [vmem:[#allocation2 + $0xff0] sm:$0xff] }
  0xdd   :  { %v1319_v63 = vadd.f32 %v1318_v24, %v508_v43  ;;  %v1344_v17 = vadd.f32 %v1343_v60, %v523_v15  ;;  %v1356_v10 = vadd.f32 %v1355_v40, %v530_v18  ;;  %v1272_v21 = vrot.slane %v1271_v37, 2  ;;  %v526_v53 = vld [vmem:[#allocation2 + $0xfb8] sm:$0xff] }
  0xde   :  { %v1284_v23 = vadd.f32 %v1283_v46, %v1282_v56  ;;  %v1307_v14 = vadd.f32 %v1306_v5, %v501_v30  ;;  %v1332_v32 = vadd.f32 %v1331_v58, %v516_v62  ;;  %v1297_v29 = vadd.f32 %v1296_v41, %v1295_v38  ;;  %v534_v3 = vld [vmem:[#allocation2 + $0xff8] sm:$0xff] }
  0xdf   :  { %v1320_v25 = vadd.f32 %v1319_v63, %v509_v27  ;;  %v1345_v55 = vadd.f32 %v1344_v17, %v524_v35  ;;  %v1357_v44 = vadd.f32 %v1356_v10, %v531_v47  ;;  %v1273_v54 = vadd.f32 %v1272_v21, %v1271_v37 }
  0xe0   :  { %v1285_v45 = vrot.slane %v1284_v23, 2  ;;  %v1308_v0 = vadd.f32 %v1307_v14, %v502_v8  ;;  %v1333_v57 = vadd.f32 %v1332_v32, %v517_v33  ;;  %v1298_v43 = vrot.slane %v1297_v29, 2 }
  0xe1   :  { %v1321_v15 = vadd.f32 %v1320_v25, %v510_v6  ;;  %v1346_v18 = vadd.f32 %v1345_v55, %v525_v11  ;;  %v1358_v51 = vadd.f32 %v1357_v44, %v532_v9  ;;  %v1274_v31 = vrot.slane %v1273_v54, 1 }
  0xe2   :  { %v1286_v56 = vadd.f32 %v1285_v45, %v1284_v23  ;;  %v1309_v30 = vrot.slane %v1308_v0, 4  ;;  %v1334_v62 = vadd.f32 %v1333_v57, %v518_v50  ;;  %v1299_v24 = vadd.f32 %v1298_v43, %v1297_v29 }
  0xe3   :  { %v1322_v38 = vrot.slane %v1321_v15, 4  ;;  %v1347_v60 = vadd.f32 %v1346_v18, %v526_v53  ;;  %v1359_v40 = vadd.f32 %v1358_v51, %v533_v34  ;;  %v1793_v27 = vadd.f32 %v1274_v31, %v1273_v54 }
  0xe4   :  { %v1287_v35 = vrot.slane %v1286_v56, 1  ;;  %v1310_v47 = vadd.f32 %v1309_v30, %v1308_v0  ;;  %v1335_v37 = vrot.slane %v1334_v62, 4  ;;  %v1300_v46 = vrot.slane %v1299_v24, 1 }
  0xe5   :  { %v1323_v5 = vadd.f32 %v1322_v38, %v1321_v15  ;;  %v1348_v58 = vrot.slane %v1347_v60, 4  ;;  %v1360_v8 = vadd.f32 %v1359_v40, %v534_v3  ;;  %v1798_v17 = vmul.f32 0.00390625, %v1678_v48  ;;  %v2119_v40 = vld [vmem:[#allocation10_spill] sm:$0xff] }
  0xe6   :  { %v1795_v33 = vadd.f32 %v1287_v35, %v1286_v56  ;;  %v1311_v41 = vrot.slane %v1310_v47, 2  ;;  %v1336_v63 = vadd.f32 %v1335_v37, %v1334_v62  ;;  %v1800_v10 = vadd.f32 %v1300_v46, %v1299_v24  ;;  %v2117_v24 = vld [vmem:[#allocation8_spill] sm:$0xff]  ;;  %v2120_v35 = vld [vmem:[#allocation11_spill] sm:$0xff] }
  0xe7   :  { %v1324_v6 = vrot.slane %v1323_v5, 2  ;;  %v1349_v11 = vadd.f32 %v1348_v58, %v1347_v60  ;;  %v1361_v9 = vrot.slane %v1360_v8, 4  ;;  %v1803_v14 = vmul.f32 0.00390625, %v1680_v49  ;;  %v2118_v60 = vld [vmem:[#allocation9_spill] sm:$0xff] }
  0xe8   :  { %v1312_v21 = vadd.f32 %v1311_v41, %v1310_v47  ;;  %v1337_v23 = vrot.slane %v1336_v63, 2  ;;  %v1806_v32 = vmul.f32 0.00390625, %v1682_v59  ;;  %v1809_v55 = vmul.f32 0.00390625, %v1684_v2  ;;  %v2121_v47 = vld [vmem:[#allocation12_spill] sm:$0xff] }
  0xe9   :  { %v1325_v50 = vadd.f32 %v1324_v6, %v1323_v5  ;;  %v1350_v29 = vrot.slane %v1349_v11, 2  ;;  %v1362_v25 = vadd.f32 %v1361_v9, %v1360_v8  ;;  %v1812_v53 = vmul.f32 0.00390625, %v1688_v12  ;;  %v2124_v5 = vld [vmem:[#allocation15_spill] sm:$0xff]  ;;  %v2125_v8 = vld [vmem:[#allocation16_spill] sm:$0xff] }
  0xea   :  { %v1313_v48 = vrot.slane %v1312_v21, 1  ;;  %v1338_v44 = vadd.f32 %v1337_v23, %v1336_v63  ;;  %v1815_v34 = vmul.f32 0.00390625, %v1691_v20  ;;  %v1818_v59 = vmul.f32 0.00390625, %v1693_v26  ;;  %v2126_v63 = vld [vmem:[#allocation17_spill] sm:$0xff] }
  0xeb   :  { %v1326_v54 = vrot.slane %v1325_v50, 1  ;;  %v1351_v49 = vadd.f32 %v1350_v29, %v1349_v11  ;;  %v1363_v45 = vrot.slane %v1362_v25, 2  ;;  %v1821_v43 = vmul.f32 0.00390625, %v1695_v39  ;;  %v2127_v11 = vld [vmem:[#allocation18_spill] sm:$0xff] }
  0xec   :  { %v1314_v0 = vadd.f32 %v1313_v48, %v1312_v21  ;;  %v1339_v57 = vrot.slane %v1338_v44, 1  ;;  %v1824_v2 = vmul.f32 0.00390625, %v1697_v1  ;;  %v1827_v20 = vmul.f32 0.00390625, %v1699_v16  ;;  %v2128_v21 = vld [vmem:[#allocation19_spill] sm:$0xff] }
  0xed   :  { %v1327_v15 = vadd.f32 %v1326_v54, %v1325_v50  ;;  %v1352_v12 = vrot.slane %v1351_v49, 1  ;;  %v1364_v18 = vadd.f32 %v1363_v45, %v1362_v25  ;;  %v1830_v3 = vmul.f32 0.00390625, %v1701_v52  ;;  %v2129_v50 = vld [vmem:[#allocation20_spill] sm:$0xff]  ;;  %v2130_v25 = vld [vmem:[#allocation21_spill] sm:$0xff] }
  0xee   :  { %v1340_v51 = vadd.f32 %v1339_v57, %v1338_v44  ;;  %v1833_v26 = vmul.f32 0.00390625, %v1703_v61  ;;  %v1836_v31 = vmul.f32 0.00390625, %v1705_v7  ;;  %v1839_v1 = vmul.f32 0.00390625, %v1707_v19  ;;  %v2131_v44 = vld [vmem:[#allocation22_spill] sm:$0xff]  ;;  %v2133_v57 = vld [vmem:[#allocation24_spill] sm:$0xff] }
  0xef   :  { %v1353_v39 = vadd.f32 %v1352_v12, %v1351_v49  ;;  %v1365_v56 = vrot.slane %v1364_v18, 1  ;;  %v1842_v30 = vmul.f32 0.00390625, %v1709_v28  ;;  %v1845_v16 = vmul.f32 0.00390625, %v1711_v42  ;;  %v2132_v49 = vld [vmem:[#allocation23_spill] sm:$0xff] }
  0xf0   :  { %v1383_v52 = vmul.f32 0.00390625, %v1713_v4  ;;  %v1384_v62 = vmul.f32 0.00390625, %v1715_v22  ;;  %v1850_v61 = vmul.f32 0.00390625, %v1717_v36  ;;  %v1853_v38 = vmul.f32 0.00390625, %v2117_v24  ;;  %v2122_v22 = vld [vmem:[#allocation13_spill] sm:$0xff]  ;;  %v2123_v36 = vld [vmem:[#allocation14_spill] sm:$0xff] }
  0xf1   :  { %v1366_v7 = vadd.f32 %v1365_v56, %v1364_v18  ;;  %v1856_v19 = vmul.f32 0.00390625, %v2118_v60  ;;  %v1859_v28 = vmul.f32 0.00390625, %v2119_v40  ;;  %v1862_v42 = vmul.f32 0.00390625, %v2120_v35  ;;  %v2134_v18 = vld [vmem:[#allocation25_spill] sm:$0xff]  ;;  %v2136_v24 = vld [vmem:[#allocation26_spill] sm:$0xff]  ;;  %v2138_v40 = vld [vmem:[#allocation27_spill] sm:$0xff] }
  0xf2   :  { %v1865_v4 = vmul.f32 0.00390625, %v2121_v47  ;;  %v1391_v37 = vmul.f32 0.00390625, %v2122_v22  ;;  %v1392_v46 = vmul.f32 0.00390625, %v2123_v36  ;;  %v1393_v58 = vmul.f32 0.00390625, %v2124_v5  ;;  %v2140_v47 = vld [vmem:[#allocation28_spill] sm:$0xff]  ;;  %v2142_v36 = vld [vmem:[#allocation29_spill] sm:$0xff] }
  0xf3   :  { %v1394_v41 = vmul.f32 0.00390625, %v2125_v8  ;;  %v1395_v6 = vmul.f32 0.00390625, %v2126_v63  ;;  %v1873_v9 = vmul.f32 0.00390625, %v2127_v11  ;;  %v1876_v23 = vmul.f32 0.00390625, %v2128_v21  ;;  %v2143_v8 = vld [vmem:[#allocation30_spill] sm:$0xff]  ;;  %v2144_v11 = vld [vmem:[#allocation31_spill] sm:$0xff] }
  0xf4   :  { %v1879_v29 = vmul.f32 0.00390625, %v2129_v50  ;;  %v1882_v48 = vmul.f32 0.00390625, %v2130_v25  ;;  %v1885_v54 = vmul.f32 0.00390625, %v2131_v44  ;;  %v1888_v45 = vmul.f32 0.00390625, %v2132_v49  ;;  %v2145_v50 = vld [vmem:[#allocation32_spill] sm:$0xff]  ;;  %v2147_v44 = vld [vmem:[#allocation33_spill] sm:$0xff] }
  0xf5   :  { %v1891_v12 = vmul.f32 0.00390625, %v2133_v57  ;;  %v1894_v56 = vmul.f32 0.00390625, %v2134_v18  ;;  %v1897_v60 = vmul.f32 0.00390625, %v2136_v24  ;;  %v1900_v35 = vmul.f32 0.00390625, %v2138_v40  ;;  %v2149_v57 = vld [vmem:[#allocation34_spill] sm:$0xff]  ;;  %v2151_v24 = vld [vmem:[#allocation35_spill] sm:$0xff] }
  0xf6   :  { %v1903_v22 = vmul.f32 0.00390625, %v2140_v47  ;;  %v1906_v5 = vmul.f32 0.00390625, %v2142_v36  ;;  %v1408_v63 = vmul.f32 0.00390625, %v2143_v8  ;;  %v1910_v21 = vmul.f32 0.00390625, %v2144_v11  ;;  %v2153_v47 = vld [vmem:[#allocation36_spill] sm:$0xff] }
  0xf7   :  { %2135 = vst [vmem:[#allocation8_spill] sm:$0xff] %v1894_v56  ;;  %2137 = vst [vmem:[#allocation9_spill] sm:$0xff] %v1897_v60  ;;  %v1913_v25 = vmul.f32 0.00390625, %v2145_v50  ;;  %v1916_v49 = vmul.f32 0.00390625, %v2147_v44  ;;  %v1919_v18 = vmul.f32 0.00390625, %v2149_v57  ;;  %v1922_v40 = vmul.f32 0.00390625, %v2151_v24 }
  0xf8   :  { %2139 = vst [vmem:[#allocation10_spill] sm:$0xff] %v1900_v35  ;;  %2141 = vst [vmem:[#allocation11_spill] sm:$0xff] %v1903_v22  ;;  %v1925_v36 = vmul.f32 0.00390625, %v2153_v47  ;;  %v2155_v22 = vld [vmem:[#allocation37_spill] sm:$0xff]  ;;  %v2156_v35 = vld [vmem:[#allocation38_spill] sm:$0xff]  ;;  %v1945_v47 = vmul.f32 0.00390625, %v1791_v13  ;;  %v1496_v13 = vsel %vm1495_vm0, %v1803_v14, %v1798_v17  ;;  %v1516_v17 = vsel %vm1495_vm0, %v1384_v62, %v1383_v52 }
  0xf9   :  { %2146 = vst [vmem:[#allocation12_spill] sm:$0xff] %v1913_v25  ;;  %2148 = vst [vmem:[#allocation13_spill] sm:$0xff] %v1916_v49  ;;  %v1415_v8 = vmul.f32 0.00390625, %v2155_v22  ;;  %v1416_v11 = vmul.f32 0.00390625, %v2156_v35  ;;  %v2157_v60 = vld [vmem:[#allocation39_spill] sm:$0xff]  ;;  %v2158_v50 = vld [vmem:[#allocation40_spill] sm:$0xff]  ;;  %v1523_v14 = vsel %vm1495_vm0, %v1392_v46, %v1391_v37 }
  0xfa   :  { %2150 = vst [vmem:[#allocation14_spill] sm:$0xff] %v1919_v18  ;;  %2152 = vst [vmem:[#allocation15_spill] sm:$0xff] %v1922_v40  ;;  %v1930_v56 = vmul.f32 0.00390625, %v2157_v60  ;;  %v1933_v25 = vmul.f32 0.00390625, %v2158_v50  ;;  %v2159_v44 = vld [vmem:[#allocation41_spill] sm:$0xff]  ;;  %v2161_v57 = vld [vmem:[#allocation42_spill] sm:$0xff] }
  0xfb   :  { %2154 = vst [vmem:[#allocation16_spill] sm:$0xff] %v1925_v36  ;;  %v1936_v49 = vmul.f32 0.00390625, %v2159_v44  ;;  %v1939_v18 = vmul.f32 0.00390625, %v2161_v57  ;;  %v2162_v24 = vld [vmem:[#allocation43_spill] sm:$0xff]  ;;  %v1423_v35 = vmul.f32 0.00390625, %v1793_v27  ;;  %v1424_v60 = vmul.f32 0.00390625, %v1795_v33 }
  0xfc   :  { %v1942_v40 = vmul.f32 0.00390625, %v2162_v24  ;;  %v1425_v22 = vmul.f32 0.00390625, %v1800_v10  ;;  %v1426_v50 = vmul.f32 0.00390625, %v1314_v0  ;;  %v1950_v36 = vmul.f32 0.00390625, %v1327_v15 }
  0xfd   :  { %2160 = vst [vmem:[#allocation17_spill] sm:$0xff] %v1936_v49  ;;  %v1952_v44 = vmul.f32 0.00390625, %v1340_v51  ;;  %v1954_v49 = vmul.f32 0.00390625, %v1353_v39  ;;  %v1956_v57 = vmul.f32 0.00390625, %v1366_v7  ;;  %v1498_v27 = vsel %vm1497_vm1, %v1806_v32, %v1496_v13 }
  0xfe   :  { %v1509_v33 = vsel %vm1495_vm0, %v1827_v20, %v1824_v2  ;;  %v1500_v10 = vsel %vm1499_vm2, %v1809_v55, %v1498_v27  ;;  %v1517_v51 = vsel %vm1497_vm1, %v1850_v61, %v1516_v17  ;;  %v1524_v2 = vsel %vm1497_vm1, %v1393_v58, %v1523_v14  ;;  %v2163_v58 = vld [vmem:[#allocation8_spill] sm:$0xff] }
  0xff   :  { %v1510_v0 = vsel %vm1497_vm1, %v1830_v3, %v1509_v33  ;;  %v1502_v15 = vsel %vm1501_vm3, %v1812_v53, %v1500_v10  ;;  %v1518_v3 = vsel %vm1499_vm2, %v1853_v38, %v1517_v51  ;;  %v1525_v39 = vsel %vm1499_vm2, %v1394_v41, %v1524_v2 }
 0x100   :  { %v1511_v32 = vsel %vm1499_vm2, %v1833_v26, %v1510_v0  ;;  %v1504_v55 = vsel %vm1503_vm4, %v1815_v34, %v1502_v15  ;;  %v1519_v52 = vsel %vm1501_vm3, %v1856_v19, %v1518_v3  ;;  %v1526_v62 = vsel %vm1501_vm3, %v1395_v6, %v1525_v39  ;;  %v2164_v6 = vld [vmem:[#allocation12_spill] sm:$0xff] }
 0x101   :  { %v1512_v20 = vsel %vm1501_vm3, %v1836_v31, %v1511_v32  ;;  %v1506_v53 = vsel %vm1505_vm5, %v1818_v59, %v1504_v55  ;;  %v1520_v61 = vsel %vm1503_vm4, %v1859_v28, %v1519_v52  ;;  %v1527_v59 = vsel %vm1503_vm4, %v1873_v9, %v1526_v62 }
 0x102   :  { %v1513_v26 = vsel %vm1503_vm4, %v1839_v1, %v1512_v20  ;;  %v1508_v34 = vsel %vm1507_vm6, %v1821_v43, %v1506_v53  ;;  %v1521_v7 = vsel %vm1505_vm5, %v1862_v42, %v1520_v61  ;;  %v1528_v38 = vsel %vm1505_vm5, %v1876_v23, %v1527_v59  ;;  %v2172_v10 = vld [vmem:[#allocation16_spill] sm:$0xff] }
 0x103   :  { %v1514_v31 = vsel %vm1505_vm5, %v1842_v30, %v1513_v26  ;;  %v1530_v43 = vsel %vm1495_vm0, %v1885_v54, %v1882_v48  ;;  %1566 = vst [vmem:[#allocation5] sm:$0xff] %v1508_v34  ;;  %v1522_v30 = vsel %vm1507_vm6, %v1865_v4, %v1521_v7  ;;  %v1529_v19 = vsel %vm1507_vm6, %v1879_v29, %v1528_v38  ;;  %v2165_v48 = vld [vmem:[#allocation9_spill] sm:$0xff] }
 0x104   :  { %v1515_v1 = vsel %vm1507_vm6, %v1845_v16, %v1514_v31  ;;  %v1531_v16 = vsel %vm1497_vm1, %v1888_v45, %v1530_v43  ;;  %v1537_v28 = vsel %vm1495_vm0, %v1408_v63, %v1906_v5  ;;  %v1544_v46 = vsel %vm1495_vm0, %v1416_v11, %v1415_v8  ;;  %1568 = vst [vmem:[#allocation5 + $0x10] sm:$0xff] %v1522_v30  ;;  %v2166_v45 = vld [vmem:[#allocation13_spill] sm:$0xff]  ;;  %v2168_v11 = vld [vmem:[#allocation14_spill] sm:$0xff] }
 0x105   :  { %1567 = vst [vmem:[#allocation5 + $0x8] sm:$0xff] %v1515_v1  ;;  %v1532_v42 = vsel %vm1499_vm2, %v1891_v12, %v1531_v16  ;;  %v1538_v37 = vsel %vm1497_vm1, %v1910_v21, %v1537_v28  ;;  %v1551_v4 = vsel %vm1495_vm0, %v1424_v60, %v1423_v35  ;;  %1569 = vst [vmem:[#allocation5 + $0x18] sm:$0xff] %v1529_v19  ;;  %v2167_v21 = vld [vmem:[#allocation10_spill] sm:$0xff]  ;;  %v2169_v24 = vld [vmem:[#allocation17_spill] sm:$0xff] }
 0x106   :  { %v1533_v41 = vsel %vm1501_vm3, %v2163_v58, %v1532_v42  ;;  %v1539_v9 = vsel %vm1499_vm2, %v2164_v6, %v1538_v37  ;;  %v1545_v23 = vsel %vm1497_vm1, %v1930_v56, %v1544_v46  ;;  %v1552_v29 = vsel %vm1497_vm1, %v1425_v22, %v1551_v4  ;;  %v2170_v22 = vld [vmem:[#allocation11_spill] sm:$0xff] }
 0x107   :  { %v1534_v54 = vsel %vm1503_vm4, %v2165_v48, %v1533_v41  ;;  %v1540_v12 = vsel %vm1501_vm3, %v2166_v45, %v1539_v9  ;;  %v1546_v5 = vsel %vm1499_vm2, %v1933_v25, %v1545_v23  ;;  %v1553_v63 = vsel %vm1499_vm2, %v1426_v50, %v1552_v29  ;;  %v2171_v25 = vld [vmem:[#allocation15_spill] sm:$0xff] }
 0x108   :  { %v1535_v8 = vsel %vm1505_vm5, %v2167_v21, %v1534_v54  ;;  %v1541_v56 = vsel %vm1503_vm4, %v2168_v11, %v1540_v12  ;;  %v1547_v35 = vsel %vm1501_vm3, %v2169_v24, %v1546_v5  ;;  %v1554_v60 = vsel %vm1501_vm3, %v1950_v36, %v1553_v63 }
 0x109   :  { %v1536_v13 = vsel %vm1507_vm6, %v2170_v22, %v1535_v8  ;;  %v1542_v50 = vsel %vm1505_vm5, %v2171_v25, %v1541_v56  ;;  %v1548_v27 = vsel %vm1503_vm4, %v1939_v18, %v1547_v35  ;;  %v1555_v33 = vsel %vm1503_vm4, %v1952_v44, %v1554_v60 }
 0x10a   :  { %v1543_v0 = vsel %vm1507_vm6, %v2172_v10, %v1542_v50  ;;  %v1549_v17 = vsel %vm1505_vm5, %v1942_v40, %v1548_v27  ;;  %v1556_v36 = vsel %vm1505_vm5, %v1954_v49, %v1555_v33  ;;  %1570 = vst [vmem:[#allocation5 + $0x20] sm:$0xff] %v1536_v13 }
 0x10b   :  { %v1550_v14 = vsel %vm1507_vm6, %v1945_v47, %v1549_v17  ;;  %v1557_v18 = vsel %vm1507_vm6, %v1956_v57, %v1556_v36  ;;  %1571 = vst [vmem:[#allocation5 + $0x28] sm:$0xff] %v1543_v0 }
 0x10c   :  { %1572 = vst [vmem:[#allocation5 + $0x30] sm:$0xff] %v1550_v14  ;;  %1573 = vst [vmem:[#allocation5 + $0x38] sm:$0xff] %v1557_v18 }
 0x10d   :  { %1628 = shalt.err (!%p1625_p12)
}
 0x10e   :  { %s1629_s24 = scalar_lea.hbm %s2080_s1, 1024 }
 0x10f   :  { %p1630_p13 = scmp.ne.s32.totalorder %s2080_s1, %s1629_s24  ;;  %p1633_p0 = scmp.lt.u32.totalorder %s1629_s24, %s2080_s1 }
 0x111   :  { %p1635_p1 = pnand %p1633_p0, %p1630_p13 }
 0x113   :  { %1638 = shalt.err (!%p1635_p1)
}
 0x114   :  { %1585 = dma.vmem_to_hbm [thread:$0]  %s1580_s20, 1024, %s2080_s1, [#allocation4], %s1644_s16, %s1644_s16, %s1645_s17  }
 0x115   :  { %1641 = dma.done.wait [#allocation4], 1024  }
 0x116   :  { %1642 = vsyncadd [#allocation4], 4294966272 }
 0x117   :  { %1589 = vsyncpa [#allocation3], 1 }
 0x118   :  { %1590 = vsyncpa [#allocation4], 1 }

</bundles_post_ra>
